<compile_context>
chip_gen: v7x
topology: tpu7x:2x2x1
jax: 0.10.0
libtpu: 0.0.40
codegen_flags: <defaults>
</compile_context>

<pallas_src>
import functools

import jax
import jax.numpy as jnp
from jax import lax
from jax.experimental import pallas as pl
from jax.experimental.pallas import tpu as pltpu

EPS = 1e-5


# --------------------------------------------------------------------------- #
# Kernels
# --------------------------------------------------------------------------- #
def _write_stats(stats_ref, y):
    """Single full-tile store of [sum; sumsq; zeros] partials for one row-tile."""
    c = y.shape[1]
    s = jnp.sum(y, axis=0, keepdims=True)           # (1, C)
    ss = jnp.sum(y * y, axis=0, keepdims=True)      # (1, C)
    stats_ref[...] = jnp.concatenate(
        [s, ss, jnp.zeros((6, c), jnp.float32)], axis=0)[None]


def _conv1x1_stats_kernel(x_ref, w_ref, y_ref, stats_ref):
    """y = x @ w (bf16 MXU, f32 acc); emit per-tile sum / sum-of-squares of y."""
    y = jnp.dot(x_ref[...].astype(jnp.bfloat16), w_ref[...],
                preferred_element_type=jnp.float32)
    y_ref[...] = y.astype(y_ref.dtype)
    _write_stats(stats_ref, y)


def _bn_relu_conv1x1_stats_kernel(x_ref, scale_ref, shift_ref, w_ref,
                                  y_ref, stats_ref):
    """y = relu(x*scale+shift) @ w; emit per-tile sum / sum-of-squares of y."""
    z = jnp.maximum(
        x_ref[...].astype(jnp.float32) * scale_ref[...] + shift_ref[...], 0.0)
    y = jnp.dot(z.astype(jnp.bfloat16), w_ref[...],
                preferred_element_type=jnp.float32)
    y_ref[...] = y.astype(y_ref.dtype)
    _write_stats(stats_ref, y)


def _bn_relu_conv3x3_stats_kernel(y1_ref, scale_ref, shift_ref, w_ref,
                                  y2_ref, stats_ref, pad_ref):
    """One image: BN1+ReLU, then 3x3 conv as a single im2col matmul (K=9*C)."""
    H, W, C = y1_ref.shape
    z = jnp.maximum(
        y1_ref[...].astype(jnp.float32) * scale_ref[...] + shift_ref[...], 0.0)

    # Zero padding via a small per-image VMEM scratch.  Only the 1-element border
    # is (re)zeroed each step — cheap, and correct even when the grid is sharded
    # across TensorCores (each core owns its own scratch).
    pad_ref[0:1, :, :] = jnp.zeros((1, W + 2, C), jnp.float32)
    pad_ref[H + 1:H + 2, :, :] = jnp.zeros((1, W + 2, C), jnp.float32)
    pad_ref[:, 0:1, :] = jnp.zeros((H + 2, 1, C), jnp.float32)
    pad_ref[:, W + 1:W + 2, :] = jnp.zeros((H + 2, 1, C), jnp.float32)
    pad_ref[1:H + 1, 1:W + 1, :] = z

    # im2col: 9 shifted views concatenated along the channel (lane) axis ->
    # one MXU matmul with K = 9*C instead of nine tiny K=C matmuls.
    patches = jnp.concatenate(
        [pad_ref[dy:dy + H, dx:dx + W, :] for dy in range(3) for dx in range(3)],
        axis=-1)
    y2 = jnp.dot(patches.reshape(H * W, 9 * C).astype(jnp.bfloat16), w_ref[...],
                 preferred_element_type=jnp.float32)

    y2_ref[...] = y2.reshape(H, W, C).astype(y2_ref.dtype)
    _write_stats(stats_ref, y2)


def _bn_add_relu_kernel(y3_ref, x_ref, scale_ref, shift_ref, out_ref):
    """Lane-dense elementwise epilogue: relu(bn3(y3) + identity)."""
    out_ref[...] = jnp.maximum(
        y3_ref[...] * scale_ref[...] + shift_ref[...] + x_ref[...], 0.0)


# --------------------------------------------------------------------------- #
# Host-side helpers (tiny per-channel glue between the pallas_calls)
# --------------------------------------------------------------------------- #
def _largest_block(total, target, quantum=8):
    """Largest divisor of `total` that is a multiple of `quantum` and <= target."""
    best = None
    for cand in range(quantum, min(target, total) + 1, quantum):
        if total % cand == 0:
            best = cand
    return best if best is not None else total


def _bn_scale_shift(stats, count, gamma, beta):
    """Fold per-tile (sum, sumsq) partials into BN scale/shift (training mode)."""
    s = jnp.sum(stats[:, 0, :], axis=0, keepdims=True)     # (1, C)
    ss = jnp.sum(stats[:, 1, :], axis=0, keepdims=True)    # (1, C)
    mean = s / count
    var = ss / count - mean * mean                          # biased variance
    scale = gamma * lax.rsqrt(var + EPS)
    shift = beta - mean * scale
    return scale, shift


# --------------------------------------------------------------------------- #
# Wrapper
# --------------------------------------------------------------------------- #
@functools.partial(jax.jit, static_argnames=("mm_rows", "out_rows"))
def bottleneck_pallas(x, params, *, mm_rows=1024, out_rows=64):
    """x: (N, H, W, Cin) float32, NHWC.  Returns (N, H, W, Cin) float32."""
    N, H, W, Cin = x.shape
    Cw = params["w1"].shape[1]
    Cout = params["w3"].shape[1]
    assert Cout == Cin, "downsample=None requires inplanes == planes*expansion"
    M = N * H * W

    # bf16 copies of the conv weights for the MXU; w2 pre-reshaped for im2col.
    w1 = params["w1"].astype(jnp.bfloat16)                        # (Cin, Cw)
    w2 = params["w2"].reshape(9 * Cw, Cw).astype(jnp.bfloat16)    # (9*Cw, Cw)
    w3 = params["w3"].astype(jnp.bfloat16)                        # (Cw, Cout)

    cparams = pltpu.CompilerParams(
        dimension_semantics=("parallel",),
        vmem_limit_bytes=32 * 1024 * 1024)

    # ---- stage 1: conv1 (1x1) + BN1 partial statistics ----------------------
    tm = _largest_block(M, mm_rows)
    g1 = M // tm
    y1, st1 = pl.pallas_call(
        _conv1x1_stats_kernel,
        grid=(g1,),
        in_specs=[
            pl.BlockSpec((tm, Cin), lambda i: (i, 0)),
            pl.BlockSpec((Cin, Cw), lambda i: (0, 0)),     # weight stays resident
        ],
        out_specs=[
            pl.BlockSpec((tm, Cw), lambda i: (i, 0)),
            pl.BlockSpec((1, 8, Cw), lambda i: (i, 0, 0)),
        ],
        out_shape=[
            jax.ShapeDtypeStruct((M, Cw), jnp.bfloat16),   # bf16 intermediate
            jax.ShapeDtypeStruct((g1, 8, Cw), jnp.float32),
        ],
        compiler_params=cparams,
    )(x.reshape(M, Cin), w1)
    scale1, shift1 = _bn_scale_shift(st1, M, params["g1"], params["b1"])

    # ---- stage 2: BN1+ReLU -> conv2 (3x3, im2col) + BN2 partial stats --------
    y2, st2 = pl.pallas_call(
        _bn_relu_conv3x3_stats_kernel,
        grid=(N,),
        in_specs=[
            pl.BlockSpec((None, H, W, Cw), lambda n: (n, 0, 0, 0)),
            pl.BlockSpec((1, Cw), lambda n: (0, 0)),
            pl.BlockSpec((1, Cw), lambda n: (0, 0)),
            pl.BlockSpec((9 * Cw, Cw), lambda n: (0, 0)),
        ],
        out_specs=[
            pl.BlockSpec((None, H, W, Cw), lambda n: (n, 0, 0, 0)),
            pl.BlockSpec((1, 8, Cw), lambda n: (n, 0, 0)),
        ],
        out_shape=[
            jax.ShapeDtypeStruct((N, H, W, Cw), jnp.bfloat16),   # bf16 intermediate
            jax.ShapeDtypeStruct((N, 8, Cw), jnp.float32),
        ],
        scratch_shapes=[pltpu.VMEM((H + 2, W + 2, Cw), jnp.float32)],
        compiler_params=cparams,
    )(y1.reshape(N, H, W, Cw), scale1, shift1, w2)
    scale2, shift2 = _bn_scale_shift(st2, M, params["g2"], params["b2"])

    # ---- stage 3: BN2+ReLU -> conv3 (1x1) + BN3 partial stats ----------------
    y3, st3 = pl.pallas_call(
        _bn_relu_conv1x1_stats_kernel,
        grid=(g1,),
        in_specs=[
            pl.BlockSpec((tm, Cw), lambda i: (i, 0)),
            pl.BlockSpec((1, Cw), lambda i: (0, 0)),
            pl.BlockSpec((1, Cw), lambda i: (0, 0)),
            pl.BlockSpec((Cw, Cout), lambda i: (0, 0)),
        ],
        out_specs=[
            pl.BlockSpec((tm, Cout), lambda i: (i, 0)),
            pl.BlockSpec((1, 8, Cout), lambda i: (i, 0, 0)),
        ],
        out_shape=[
            jax.ShapeDtypeStruct((M, Cout), jnp.float32),   # feeds output; keep f32
            jax.ShapeDtypeStruct((g1, 8, Cout), jnp.float32),
        ],
        compiler_params=cparams,
    )(y2.reshape(M, Cw), scale2, shift2, w3)
    scale3, shift3 = _bn_scale_shift(st3, M, params["g3"], params["b3"])

    # ---- stage 4: BN3 + residual add + ReLU (lane-dense slab) ----------------
    rows, lanes = N * H, W * Cout
    rb = _largest_block(rows, out_rows)
    g4 = rows // rb
    scale3t = jnp.tile(scale3, (1, W))       # (1, W*Cout), channel fastest
    shift3t = jnp.tile(shift3, (1, W))
    out = pl.pallas_call(
        _bn_add_relu_kernel,
        grid=(g4,),
        in_specs=[
            pl.BlockSpec((rb, lanes), lambda i: (i, 0)),
            pl.BlockSpec((rb, lanes), lambda i: (i, 0)),
            pl.BlockSpec((1, lanes), lambda i: (0, 0)),
            pl.BlockSpec((1, lanes), lambda i: (0, 0)),
        ],
        out_specs=pl.BlockSpec((rb, lanes), lambda i: (i, 0)),
        out_shape=jax.ShapeDtypeStruct((rows, lanes), jnp.float32),
        compiler_params=cparams,
    )(y3.reshape(rows, lanes), x.reshape(rows, W * Cin), scale3t, shift3t)

    return out.reshape(N, H, W, Cout)


# --------------------------------- reference --------------------------------- #
def _bn_train_ref(y, gamma, beta):
    mean = jnp.mean(y, axis=(0, 1, 2), keepdims=True)
    var = jnp.mean((y - mean) ** 2, axis=(0, 1, 2), keepdims=True)
    g = gamma.reshape(1, 1, 1, -1)
    b = beta.reshape(1, 1, 1, -1)
    return (y - mean) / jnp.sqrt(var + EPS) * g + b


def bottleneck_ref(x, params):
    dn = ("NHWC", "HWIO", "NHWC")
    y = lax.conv_general_dilated(x, params["w1"][None, None], (1, 1), "SAME",
                                 dimension_numbers=dn)
    y = jax.nn.relu(_bn_train_ref(y, params["g1"], params["b1"]))
    y = lax.conv_general_dilated(y, params["w2"], (1, 1), "SAME",
                                 dimension_numbers=dn)
    y = jax.nn.relu(_bn_train_ref(y, params["g2"], params["b2"]))
    y = lax.conv_general_dilated(y, params["w3"][None, None], (1, 1), "SAME",
                                 dimension_numbers=dn)
    y = _bn_train_ref(y, params["g3"], params["b3"])
    return jax.nn.relu(y + x)


# ------------------------------------ main ------------------------------------ #
if __name__ == "__main__":
    # Bottleneck(inplanes=32, planes=8): width=8, out_channels=planes*4=32.
    N, H, W = 2, 8, 8
    inplanes, planes = 32, 8
    width = planes                 # base_width=64, groups=1
    out_ch = planes * 4

    key = jax.random.PRNGKey(0)
    ks = jax.random.split(key, 10)
    params = {
        "w1": 0.1 * jax.random.normal(ks[0], (inplanes, width), jnp.float32),
        "g1": 1.0 + 0.1 * jax.random.normal(ks[1], (1, width), jnp.float32),
        "b1": 0.1 * jax.random.normal(ks[2], (1, width), jnp.float32),
        "w2": 0.1 * jax.random.normal(ks[3], (3, 3, width, width), jnp.float32),
        "g2": 1.0 + 0.1 * jax.random.normal(ks[4], (1, width), jnp.float32),
        "b2": 0.1 * jax.random.normal(ks[5], (1, width), jnp.float32),
        "w3": 0.1 * jax.random.normal(ks[6], (width, out_ch), jnp.float32),
        "g3": 1.0 + 0.1 * jax.random.normal(ks[7], (1, out_ch), jnp.float32),
        "b3": 0.1 * jax.random.normal(ks[8], (1, out_ch), jnp.float32),
    }

    # Input in NHWC (corresponds to PyTorch NCHW (N, inplanes, H, W)).
    x = jax.random.normal(ks[9], (N, H, W, inplanes), jnp.float32)

    # Small tiles so the demo exercises multi-step grids; defaults target
    # realistic shapes (and still fit v7x's 64 MiB VMEM).
    out = jax.block_until_ready(bottleneck_pallas(x, params, mm_rows=64, out_rows=8))
    ref = jax.block_until_ready(bottleneck_ref(x, params))

    # Tolerance accounts for bf16 MXU inputs and bf16 intermediate activations
    # (f32 accumulation, f32 BN statistics).
    if not jnp.allclose(out, ref, atol=1e-1, rtol=5e-2):
        max_err = float(jnp.max(jnp.abs(out - ref)))
        raise AssertionError(f"Pallas kernel mismatch vs reference, max_err={max_err}")

    print("KERNEL_OK")
</pallas_src>

<mosaic_0001>
module attributes {stable_mosaic.version = 11 : i64} {
  func.func @_conv1x1_stats_kernel(%arg0: i32, %arg1: memref<64x32xf32, #tpu.memory_space<vmem>>, %arg2: memref<32x8xbf16, #tpu.memory_space<vmem>>, %arg3: memref<64x8xbf16, #tpu.memory_space<vmem>>, %arg4: memref<1x8x8xf32, #tpu.memory_space<vmem>>) attributes {dimension_semantics = [#tpu.dimension_semantics<parallel>], iteration_bounds = array<i64: 2>, scalar_prefetch = 0 : i64, scratch_operands = 0 : i64, tpu.core_type = #tpu.core_type<tc>, window_params = [{transform_indices = @transform_0, window_bounds = array<i64: 64, 32>}, {pipeline_mode = #tpu.pipeline_mode<synchronous>, transform_indices = @transform_1, window_bounds = array<i64: 32, 8>}, {transform_indices = @transform_2, window_bounds = array<i64: 64, 8>}, {transform_indices = @transform_3, window_bounds = array<i64: 1, 8, 8>}]} {
    %c0 = arith.constant 0 : index
    %c0_0 = arith.constant 0 : index
    %0 = vector.load %arg1[%c0, %c0_0] : memref<64x32xf32, #tpu.memory_space<vmem>>, vector<64x32xf32>
    %1 = arith.truncf %0 : vector<64x32xf32> to vector<64x32xbf16>
    %c0_1 = arith.constant 0 : index
    %c0_2 = arith.constant 0 : index
    %2 = vector.load %arg2[%c0_1, %c0_2] : memref<32x8xbf16, #tpu.memory_space<vmem>>, vector<32x8xbf16>
    %cst = arith.constant dense<0.000000e+00> : vector<64x8xf32>
    %3 = tpu.matmul %1, %2, %cst {dimension_numbers = #tpu.dot_dimension_numbers<[1], [0], [0], [1], [0, 0, 1, 1], [], []>} : vector<64x32xbf16>, vector<32x8xbf16>, vector<64x8xf32> -> vector<64x8xf32>
    %4 = arith.truncf %3 : vector<64x8xf32> to vector<64x8xbf16>
    %c0_3 = arith.constant 0 : index
    %c0_4 = arith.constant 0 : index
    %5 = vector.load %arg3[%c0_3, %c0_4] : memref<64x8xbf16, #tpu.memory_space<vmem>>, vector<64x8xbf16>
    tpu.vector_store %arg3[%c0_3, %c0_4], %4 {strides = array<i32>} : memref<64x8xbf16, #tpu.memory_space<vmem>>, vector<64x8xbf16>,
    %cst_5 = arith.constant dense<0.000000e+00> : vector<8xf32>
    %6 = vector.multi_reduction <add>, %3, %cst_5 [0] : vector<64x8xf32> to vector<8xf32>
    %7 = vector.shape_cast %6 : vector<8xf32> to vector<1x8xf32>
    %8 = arith.mulf %3, %3 : vector<64x8xf32>
    %cst_6 = arith.constant dense<0.000000e+00> : vector<8xf32>
    %9 = vector.multi_reduction <add>, %8, %cst_6 [0] : vector<64x8xf32> to vector<8xf32>
    %10 = vector.shape_cast %9 : vector<8xf32> to vector<1x8xf32>
    %cst_7 = arith.constant 0.000000e+00 : f32
    %11 = vector.broadcast %cst_7 : f32 to vector<6x8xf32>
    %12 = tpu.concatenate %7, %10, %11 in 0 : vector<1x8xf32>, vector<1x8xf32>, vector<6x8xf32> -> vector<8x8xf32>
    %13 = vector.shape_cast %12 : vector<8x8xf32> to vector<1x8x8xf32>
    %c0_8 = arith.constant 0 : index
    %c0_9 = arith.constant 0 : index
    %c0_10 = arith.constant 0 : index
    %14 = vector.load %arg4[%c0_8, %c0_9, %c0_10] : memref<1x8x8xf32, #tpu.memory_space<vmem>>, vector<1x8x8xf32>
    tpu.vector_store %arg4[%c0_8, %c0_9, %c0_10], %13 {strides = array<i32>} : memref<1x8x8xf32, #tpu.memory_space<vmem>>, vector<1x8x8xf32>,
    return
  }
  func.func @transform_0(%arg0: i32) -> (i32, i32) {
    %c0_i32 = arith.constant 0 : i32
    %c0_i32_0 = arith.constant 0 : i32
    return %arg0, %c0_i32 : i32, i32
  }
  func.func @transform_1(%arg0: i32) -> (i32, i32) {
    %c0_i32 = arith.constant 0 : i32
    %c0_i32_0 = arith.constant 0 : i32
    %c0_i32_1 = arith.constant 0 : i32
    return %c0_i32, %c0_i32_0 : i32, i32
  }
  func.func @transform_2(%arg0: i32) -> (i32, i32) {
    %c0_i32 = arith.constant 0 : i32
    %c0_i32_0 = arith.constant 0 : i32
    return %arg0, %c0_i32 : i32, i32
  }
  func.func @transform_3(%arg0: i32) -> (i32, i32, i32) {
    %c0_i32 = arith.constant 0 : i32
    %c0_i32_0 = arith.constant 0 : i32
    %c0_i32_1 = arith.constant 0 : i32
    return %arg0, %c0_i32, %c0_i32_0 : i32, i32, i32
  }
}

module attributes {stable_mosaic.version = 11 : i64} {
  func.func @_bn_relu_conv3x3_stats_kernel(%arg0: i32, %arg1: memref<1x8x8x8xbf16, #tpu.memory_space<vmem>>, %arg2: memref<1x8xf32, #tpu.memory_space<vmem>>, %arg3: memref<1x8xf32, #tpu.memory_space<vmem>>, %arg4: memref<72x8xbf16, #tpu.memory_space<vmem>>, %arg5: memref<1x8x8x8xbf16, #tpu.memory_space<vmem>>, %arg6: memref<1x8x8xf32, #tpu.memory_space<vmem>>, %arg7: memref<10x10x8xf32, #tpu.memory_space<vmem>>) attributes {dimension_semantics = [#tpu.dimension_semantics<parallel>], iteration_bounds = array<i64: 2>, scalar_prefetch = 0 : i64, scratch_operands = 1 : i64, tpu.core_type = #tpu.core_type<tc>, window_params = [{transform_indices = @transform_0, window_bounds = array<i64: 1, 8, 8, 8>}, {pipeline_mode = #tpu.pipeline_mode<synchronous>, transform_indices = @transform_1, window_bounds = array<i64: 1, 8>}, {pipeline_mode = #tpu.pipeline_mode<synchronous>, transform_indices = @transform_2, window_bounds = array<i64: 1, 8>}, {pipeline_mode = #tpu.pipeline_mode<synchronous>, transform_indices = @transform_3, window_bounds = array<i64: 72, 8>}, {transform_indices = @transform_4, window_bounds = array<i64: 1, 8, 8, 8>}, {transform_indices = @transform_5, window_bounds = array<i64: 1, 8, 8>}]} {
    %c0 = arith.constant 0 : index
    %c0_0 = arith.constant 0 : index
    %c0_1 = arith.constant 0 : index
    %c0_2 = arith.constant 0 : index
    %0 = vector.load %arg1[%c0, %c0_0, %c0_1, %c0_2] : memref<1x8x8x8xbf16, #tpu.memory_space<vmem>>, vector<1x8x8x8xbf16>
    %1 = vector.shape_cast %0 : vector<1x8x8x8xbf16> to vector<8x8x8xbf16>
    %2 = arith.extf %1 : vector<8x8x8xbf16> to vector<8x8x8xf32>
    %c0_3 = arith.constant 0 : index
    %c0_4 = arith.constant 0 : index
    %3 = vector.load %arg2[%c0_3, %c0_4] : memref<1x8xf32, #tpu.memory_space<vmem>>, vector<1x8xf32>
    %4 = vector.shape_cast %3 : vector<1x8xf32> to vector<1x1x8xf32>
    %5 = vector.broadcast %4 : vector<1x1x8xf32> to vector<8x8x8xf32>
    %6 = arith.mulf %2, %5 : vector<8x8x8xf32>
    %c0_5 = arith.constant 0 : index
    %c0_6 = arith.constant 0 : index
    %7 = vector.load %arg3[%c0_5, %c0_6] : memref<1x8xf32, #tpu.memory_space<vmem>>, vector<1x8xf32>
    %8 = vector.shape_cast %7 : vector<1x8xf32> to vector<1x1x8xf32>
    %9 = vector.broadcast %8 : vector<1x1x8xf32> to vector<8x8x8xf32>
    %10 = arith.addf %6, %9 : vector<8x8x8xf32>
    %cst = arith.constant 0.000000e+00 : f32
    %11 = vector.broadcast %cst : f32 to vector<8x8x8xf32>
    %12 = arith.maximumf %10, %11 : vector<8x8x8xf32>
    %cst_7 = arith.constant 0.000000e+00 : f32
    %13 = vector.broadcast %cst_7 : f32 to vector<1x10x8xf32>
    %c0_8 = arith.constant 0 : index
    %c0_9 = arith.constant 0 : index
    %c0_10 = arith.constant 0 : index
    %14 = vector.load %arg7[%c0_8, %c0_9, %c0_10] : memref<10x10x8xf32, #tpu.memory_space<vmem>>, vector<1x10x8xf32>
    tpu.vector_store %arg7[%c0_8, %c0_9, %c0_10], %13 {strides = array<i32>} : memref<10x10x8xf32, #tpu.memory_space<vmem>>, vector<1x10x8xf32>,
    %cst_11 = arith.constant 0.000000e+00 : f32
    %15 = vector.broadcast %cst_11 : f32 to vector<1x10x8xf32>
    %c9 = arith.constant 9 : index
    %c0_12 = arith.constant 0 : index
    %c0_13 = arith.constant 0 : index
    %16 = vector.load %arg7[%c9, %c0_12, %c0_13] : memref<10x10x8xf32, #tpu.memory_space<vmem>>, vector<1x10x8xf32>
    tpu.vector_store %arg7[%c9, %c0_12, %c0_13], %15 {strides = array<i32>} : memref<10x10x8xf32, #tpu.memory_space<vmem>>, vector<1x10x8xf32>,
    %cst_14 = arith.constant 0.000000e+00 : f32
    %17 = vector.broadcast %cst_14 : f32 to vector<10x1x8xf32>
    %c0_15 = arith.constant 0 : index
    %c0_16 = arith.constant 0 : index
    %c0_17 = arith.constant 0 : index
    %18 = vector.load %arg7[%c0_15, %c0_16, %c0_17] : memref<10x10x8xf32, #tpu.memory_space<vmem>>, vector<10x1x8xf32>
    tpu.vector_store %arg7[%c0_15, %c0_16, %c0_17], %17 {strides = array<i32>} : memref<10x10x8xf32, #tpu.memory_space<vmem>>, vector<10x1x8xf32>,
    %cst_18 = arith.constant 0.000000e+00 : f32
    %19 = vector.broadcast %cst_18 : f32 to vector<10x1x8xf32>
    %c0_19 = arith.constant 0 : index
    %c9_20 = arith.constant 9 : index
    %c0_21 = arith.constant 0 : index
    %20 = vector.load %arg7[%c0_19, %c9_20, %c0_21] : memref<10x10x8xf32, #tpu.memory_space<vmem>>, vector<10x1x8xf32>
    tpu.vector_store %arg7[%c0_19, %c9_20, %c0_21], %19 {strides = array<i32>} : memref<10x10x8xf32, #tpu.memory_space<vmem>>, vector<10x1x8xf32>,
    %c1 = arith.constant 1 : index
    %c1_22 = arith.constant 1 : index
    %c0_23 = arith.constant 0 : index
    %21 = vector.load %arg7[%c1, %c1_22, %c0_23] : memref<10x10x8xf32, #tpu.memory_space<vmem>>, vector<8x8x8xf32>
    tpu.vector_store %arg7[%c1, %c1_22, %c0_23], %12 {strides = array<i32>} : memref<10x10x8xf32, #tpu.memory_space<vmem>>, vector<8x8x8xf32>,
    %c0_24 = arith.constant 0 : index
    %c0_25 = arith.constant 0 : index
    %c0_26 = arith.constant 0 : index
    %22 = vector.load %arg7[%c0_24, %c0_25, %c0_26] : memref<10x10x8xf32, #tpu.memory_space<vmem>>, vector<8x8x8xf32>
    %c0_27 = arith.constant 0 : index
    %c1_28 = arith.constant 1 : index
    %c0_29 = arith.constant 0 : index
    %23 = vector.load %arg7[%c0_27, %c1_28, %c0_29] : memref<10x10x8xf32, #tpu.memory_space<vmem>>, vector<8x8x8xf32>
    %c0_30 = arith.constant 0 : index
    %c2 = arith.constant 2 : index
    %c0_31 = arith.constant 0 : index
    %24 = vector.load %arg7[%c0_30, %c2, %c0_31] : memref<10x10x8xf32, #tpu.memory_space<vmem>>, vector<8x8x8xf32>
    %c1_32 = arith.constant 1 : index
    %c0_33 = arith.constant 0 : index
    %c0_34 = arith.constant 0 : index
    %25 = vector.load %arg7[%c1_32, %c0_33, %c0_34] : memref<10x10x8xf32, #tpu.memory_space<vmem>>, vector<8x8x8xf32>
    %c1_35 = arith.constant 1 : index
    %c1_36 = arith.constant 1 : index
    %c0_37 = arith.constant 0 : index
    %26 = vector.load %arg7[%c1_35, %c1_36, %c0_37] : memref<10x10x8xf32, #tpu.memory_space<vmem>>, vector<8x8x8xf32>
    %c1_38 = arith.constant 1 : index
    %c2_39 = arith.constant 2 : index
    %c0_40 = arith.constant 0 : index
    %27 = vector.load %arg7[%c1_38, %c2_39, %c0_40] : memref<10x10x8xf32, #tpu.memory_space<vmem>>, vector<8x8x8xf32>
    %c2_41 = arith.constant 2 : index
    %c0_42 = arith.constant 0 : index
    %c0_43 = arith.constant 0 : index
    %28 = vector.load %arg7[%c2_41, %c0_42, %c0_43] : memref<10x10x8xf32, #tpu.memory_space<vmem>>, vector<8x8x8xf32>
    %c2_44 = arith.constant 2 : index
    %c1_45 = arith.constant 1 : index
    %c0_46 = arith.constant 0 : index
    %29 = vector.load %arg7[%c2_44, %c1_45, %c0_46] : memref<10x10x8xf32, #tpu.memory_space<vmem>>, vector<8x8x8xf32>
    %c2_47 = arith.constant 2 : index
    %c2_48 = arith.constant 2 : index
    %c0_49 = arith.constant 0 : index
    %30 = vector.load %arg7[%c2_47, %c2_48, %c0_49] : memref<10x10x8xf32, #tpu.memory_space<vmem>>, vector<8x8x8xf32>
    %31 = tpu.concatenate %22, %23, %24, %25, %26, %27, %28, %29, %30 in 2 : vector<8x8x8xf32>, vector<8x8x8xf32>, vector<8x8x8xf32>, vector<8x8x8xf32>, vector<8x8x8xf32>, vector<8x8x8xf32>, vector<8x8x8xf32>, vector<8x8x8xf32>, vector<8x8x8xf32> -> vector<8x8x72xf32>
    %32 = vector.shape_cast %31 : vector<8x8x72xf32> to vector<64x72xf32>
    %33 = arith.truncf %32 : vector<64x72xf32> to vector<64x72xbf16>
    %c0_50 = arith.constant 0 : index
    %c0_51 = arith.constant 0 : index
    %34 = vector.load %arg4[%c0_50, %c0_51] : memref<72x8xbf16, #tpu.memory_space<vmem>>, vector<72x8xbf16>
    %cst_52 = arith.constant dense<0.000000e+00> : vector<64x8xf32>
    %35 = tpu.matmul %33, %34, %cst_52 {dimension_numbers = #tpu.dot_dimension_numbers<[1], [0], [0], [1], [0, 0, 1, 1], [], []>} : vector<64x72xbf16>, vector<72x8xbf16>, vector<64x8xf32> -> vector<64x8xf32>
    %36 = vector.shape_cast %35 : vector<64x8xf32> to vector<8x8x8xf32>
    %37 = arith.truncf %36 : vector<8x8x8xf32> to vector<8x8x8xbf16>
    %c0_53 = arith.constant 0 : index
    %c0_54 = arith.constant 0 : index
    %c0_55 = arith.constant 0 : index
    %c0_56 = arith.constant 0 : index
    %38 = vector.load %arg5[%c0_53, %c0_54, %c0_55, %c0_56] : memref<1x8x8x8xbf16, #tpu.memory_space<vmem>>, vector<1x8x8x8xbf16>
    %39 = vector.shape_cast %38 : vector<1x8x8x8xbf16> to vector<8x8x8xbf16>
    %40 = vector.shape_cast %37 : vector<8x8x8xbf16> to vector<1x8x8x8xbf16>
    tpu.vector_store %arg5[%c0_53, %c0_54, %c0_55, %c0_56], %40 {strides = array<i32>} : memref<1x8x8x8xbf16, #tpu.memory_space<vmem>>, vector<1x8x8x8xbf16>,
    %cst_57 = arith.constant dense<0.000000e+00> : vector<8xf32>
    %41 = vector.multi_reduction <add>, %35, %cst_57 [0] : vector<64x8xf32> to vector<8xf32>
    %42 = vector.shape_cast %41 : vector<8xf32> to vector<1x8xf32>
    %43 = arith.mulf %35, %35 : vector<64x8xf32>
    %cst_58 = arith.constant dense<0.000000e+00> : vector<8xf32>
    %44 = vector.multi_reduction <add>, %43, %cst_58 [0] : vector<64x8xf32> to vector<8xf32>
    %45 = vector.shape_cast %44 : vector<8xf32> to vector<1x8xf32>
    %cst_59 = arith.constant 0.000000e+00 : f32
    %46 = vector.broadcast %cst_59 : f32 to vector<6x8xf32>
    %47 = tpu.concatenate %42, %45, %46 in 0 : vector<1x8xf32>, vector<1x8xf32>, vector<6x8xf32> -> vector<8x8xf32>
    %48 = vector.shape_cast %47 : vector<8x8xf32> to vector<1x8x8xf32>
    %c0_60 = arith.constant 0 : index
    %c0_61 = arith.constant 0 : index
    %c0_62 = arith.constant 0 : index
    %49 = vector.load %arg6[%c0_60, %c0_61, %c0_62] : memref<1x8x8xf32, #tpu.memory_space<vmem>>, vector<1x8x8xf32>
    tpu.vector_store %arg6[%c0_60, %c0_61, %c0_62], %48 {strides = array<i32>} : memref<1x8x8xf32, #tpu.memory_space<vmem>>, vector<1x8x8xf32>,
    return
  }
  func.func @transform_0(%arg0: i32) -> (i32, i32, i32, i32) {
    %c0_i32 = arith.constant 0 : i32
    %c0_i32_0 = arith.constant 0 : i32
    %c0_i32_1 = arith.constant 0 : i32
    %c0_i32_2 = arith.constant 0 : i32
    return %arg0, %c0_i32, %c0_i32_0, %c0_i32_1 : i32, i32, i32, i32
  }
  func.func @transform_1(%arg0: i32) -> (i32, i32) {
    %c0_i32 = arith.constant 0 : i32
    %c0_i32_0 = arith.constant 0 : i32
    %c0_i32_1 = arith.constant 0 : i32
    return %c0_i32, %c0_i32_0 : i32, i32
  }
  func.func @transform_2(%arg0: i32) -> (i32, i32) {
    %c0_i32 = arith.constant 0 : i32
    %c0_i32_0 = arith.constant 0 : i32
    %c0_i32_1 = arith.constant 0 : i32
    return %c0_i32, %c0_i32_0 : i32, i32
  }
  func.func @transform_3(%arg0: i32) -> (i32, i32) {
    %c0_i32 = arith.constant 0 : i32
    %c0_i32_0 = arith.constant 0 : i32
    %c0_i32_1 = arith.constant 0 : i32
    return %c0_i32, %c0_i32_0 : i32, i32
  }
  func.func @transform_4(%arg0: i32) -> (i32, i32, i32, i32) {
    %c0_i32 = arith.constant 0 : i32
    %c0_i32_0 = arith.constant 0 : i32
    %c0_i32_1 = arith.constant 0 : i32
    %c0_i32_2 = arith.constant 0 : i32
    return %arg0, %c0_i32, %c0_i32_0, %c0_i32_1 : i32, i32, i32, i32
  }
  func.func @transform_5(%arg0: i32) -> (i32, i32, i32) {
    %c0_i32 = arith.constant 0 : i32
    %c0_i32_0 = arith.constant 0 : i32
    %c0_i32_1 = arith.constant 0 : i32
    return %arg0, %c0_i32, %c0_i32_0 : i32, i32, i32
  }
}

module attributes {stable_mosaic.version = 11 : i64} {
  func.func @_bn_relu_conv1x1_stats_kernel(%arg0: i32, %arg1: memref<64x8xbf16, #tpu.memory_space<vmem>>, %arg2: memref<1x8xf32, #tpu.memory_space<vmem>>, %arg3: memref<1x8xf32, #tpu.memory_space<vmem>>, %arg4: memref<8x32xbf16, #tpu.memory_space<vmem>>, %arg5: memref<64x32xf32, #tpu.memory_space<vmem>>, %arg6: memref<1x8x32xf32, #tpu.memory_space<vmem>>) attributes {dimension_semantics = [#tpu.dimension_semantics<parallel>], iteration_bounds = array<i64: 2>, scalar_prefetch = 0 : i64, scratch_operands = 0 : i64, tpu.core_type = #tpu.core_type<tc>, window_params = [{transform_indices = @transform_0, window_bounds = array<i64: 64, 8>}, {pipeline_mode = #tpu.pipeline_mode<synchronous>, transform_indices = @transform_1, window_bounds = array<i64: 1, 8>}, {pipeline_mode = #tpu.pipeline_mode<synchronous>, transform_indices = @transform_2, window_bounds = array<i64: 1, 8>}, {pipeline_mode = #tpu.pipeline_mode<synchronous>, transform_indices = @transform_3, window_bounds = array<i64: 8, 32>}, {transform_indices = @transform_4, window_bounds = array<i64: 64, 32>}, {transform_indices = @transform_5, window_bounds = array<i64: 1, 8, 32>}]} {
    %c0 = arith.constant 0 : index
    %c0_0 = arith.constant 0 : index
    %0 = vector.load %arg1[%c0, %c0_0] : memref<64x8xbf16, #tpu.memory_space<vmem>>, vector<64x8xbf16>
    %1 = arith.extf %0 : vector<64x8xbf16> to vector<64x8xf32>
    %c0_1 = arith.constant 0 : index
    %c0_2 = arith.constant 0 : index
    %2 = vector.load %arg2[%c0_1, %c0_2] : memref<1x8xf32, #tpu.memory_space<vmem>>, vector<1x8xf32>
    %3 = vector.broadcast %2 : vector<1x8xf32> to vector<64x8xf32>
    %4 = arith.mulf %1, %3 : vector<64x8xf32>
    %c0_3 = arith.constant 0 : index
    %c0_4 = arith.constant 0 : index
    %5 = vector.load %arg3[%c0_3, %c0_4] : memref<1x8xf32, #tpu.memory_space<vmem>>, vector<1x8xf32>
    %6 = vector.broadcast %5 : vector<1x8xf32> to vector<64x8xf32>
    %7 = arith.addf %4, %6 : vector<64x8xf32>
    %cst = arith.constant 0.000000e+00 : f32
    %8 = vector.broadcast %cst : f32 to vector<64x8xf32>
    %9 = arith.maximumf %7, %8 : vector<64x8xf32>
    %10 = arith.truncf %9 : vector<64x8xf32> to vector<64x8xbf16>
    %c0_5 = arith.constant 0 : index
    %c0_6 = arith.constant 0 : index
    %11 = vector.load %arg4[%c0_5, %c0_6] : memref<8x32xbf16, #tpu.memory_space<vmem>>, vector<8x32xbf16>
    %cst_7 = arith.constant dense<0.000000e+00> : vector<64x32xf32>
    %12 = tpu.matmul %10, %11, %cst_7 {dimension_numbers = #tpu.dot_dimension_numbers<[1], [0], [0], [1], [0, 0, 1, 1], [], []>} : vector<64x8xbf16>, vector<8x32xbf16>, vector<64x32xf32> -> vector<64x32xf32>
    %c0_8 = arith.constant 0 : index
    %c0_9 = arith.constant 0 : index
    %13 = vector.load %arg5[%c0_8, %c0_9] : memref<64x32xf32, #tpu.memory_space<vmem>>, vector<64x32xf32>
    tpu.vector_store %arg5[%c0_8, %c0_9], %12 {strides = array<i32>} : memref<64x32xf32, #tpu.memory_space<vmem>>, vector<64x32xf32>,
    %cst_10 = arith.constant dense<0.000000e+00> : vector<32xf32>
    %14 = vector.multi_reduction <add>, %12, %cst_10 [0] : vector<64x32xf32> to vector<32xf32>
    %15 = vector.shape_cast %14 : vector<32xf32> to vector<1x32xf32>
    %16 = arith.mulf %12, %12 : vector<64x32xf32>
    %cst_11 = arith.constant dense<0.000000e+00> : vector<32xf32>
    %17 = vector.multi_reduction <add>, %16, %cst_11 [0] : vector<64x32xf32> to vector<32xf32>
    %18 = vector.shape_cast %17 : vector<32xf32> to vector<1x32xf32>
    %cst_12 = arith.constant 0.000000e+00 : f32
    %19 = vector.broadcast %cst_12 : f32 to vector<6x32xf32>
    %20 = tpu.concatenate %15, %18, %19 in 0 : vector<1x32xf32>, vector<1x32xf32>, vector<6x32xf32> -> vector<8x32xf32>
    %21 = vector.shape_cast %20 : vector<8x32xf32> to vector<1x8x32xf32>
    %c0_13 = arith.constant 0 : index
    %c0_14 = arith.constant 0 : index
    %c0_15 = arith.constant 0 : index
    %22 = vector.load %arg6[%c0_13, %c0_14, %c0_15] : memref<1x8x32xf32, #tpu.memory_space<vmem>>, vector<1x8x32xf32>
    tpu.vector_store %arg6[%c0_13, %c0_14, %c0_15], %21 {strides = array<i32>} : memref<1x8x32xf32, #tpu.memory_space<vmem>>, vector<1x8x32xf32>,
    return
  }
  func.func @transform_0(%arg0: i32) -> (i32, i32) {
    %c0_i32 = arith.constant 0 : i32
    %c0_i32_0 = arith.constant 0 : i32
    return %arg0, %c0_i32 : i32, i32
  }
  func.func @transform_1(%arg0: i32) -> (i32, i32) {
    %c0_i32 = arith.constant 0 : i32
    %c0_i32_0 = arith.constant 0 : i32
    %c0_i32_1 = arith.constant 0 : i32
    return %c0_i32, %c0_i32_0 : i32, i32
  }
  func.func @transform_2(%arg0: i32) -> (i32, i32) {
    %c0_i32 = arith.constant 0 : i32
    %c0_i32_0 = arith.constant 0 : i32
    %c0_i32_1 = arith.constant 0 : i32
    return %c0_i32, %c0_i32_0 : i32, i32
  }
  func.func @transform_3(%arg0: i32) -> (i32, i32) {
    %c0_i32 = arith.constant 0 : i32
    %c0_i32_0 = arith.constant 0 : i32
    %c0_i32_1 = arith.constant 0 : i32
    return %c0_i32, %c0_i32_0 : i32, i32
  }
  func.func @transform_4(%arg0: i32) -> (i32, i32) {
    %c0_i32 = arith.constant 0 : i32
    %c0_i32_0 = arith.constant 0 : i32
    return %arg0, %c0_i32 : i32, i32
  }
  func.func @transform_5(%arg0: i32) -> (i32, i32, i32) {
    %c0_i32 = arith.constant 0 : i32
    %c0_i32_0 = arith.constant 0 : i32
    %c0_i32_1 = arith.constant 0 : i32
    return %arg0, %c0_i32, %c0_i32_0 : i32, i32, i32
  }
}

module attributes {stable_mosaic.version = 11 : i64} {
  func.func @_bn_add_relu_kernel(%arg0: i32, %arg1: memref<8x256xf32, #tpu.memory_space<vmem>>, %arg2: memref<8x256xf32, #tpu.memory_space<vmem>>, %arg3: memref<1x256xf32, #tpu.memory_space<vmem>>, %arg4: memref<1x256xf32, #tpu.memory_space<vmem>>, %arg5: memref<8x256xf32, #tpu.memory_space<vmem>>) attributes {dimension_semantics = [#tpu.dimension_semantics<parallel>], iteration_bounds = array<i64: 2>, scalar_prefetch = 0 : i64, scratch_operands = 0 : i64, tpu.core_type = #tpu.core_type<tc>, window_params = [{transform_indices = @transform_0, window_bounds = array<i64: 8, 256>}, {transform_indices = @transform_1, window_bounds = array<i64: 8, 256>}, {pipeline_mode = #tpu.pipeline_mode<synchronous>, transform_indices = @transform_2, window_bounds = array<i64: 1, 256>}, {pipeline_mode = #tpu.pipeline_mode<synchronous>, transform_indices = @transform_3, window_bounds = array<i64: 1, 256>}, {transform_indices = @transform_4, window_bounds = array<i64: 8, 256>}]} {
    %c0 = arith.constant 0 : index
    %c0_0 = arith.constant 0 : index
    %0 = vector.load %arg1[%c0, %c0_0] : memref<8x256xf32, #tpu.memory_space<vmem>>, vector<8x256xf32>
    %c0_1 = arith.constant 0 : index
    %c0_2 = arith.constant 0 : index
    %1 = vector.load %arg3[%c0_1, %c0_2] : memref<1x256xf32, #tpu.memory_space<vmem>>, vector<1x256xf32>
    %2 = vector.broadcast %1 : vector<1x256xf32> to vector<8x256xf32>
    %3 = arith.mulf %0, %2 : vector<8x256xf32>
    %c0_3 = arith.constant 0 : index
    %c0_4 = arith.constant 0 : index
    %4 = vector.load %arg4[%c0_3, %c0_4] : memref<1x256xf32, #tpu.memory_space<vmem>>, vector<1x256xf32>
    %5 = vector.broadcast %4 : vector<1x256xf32> to vector<8x256xf32>
    %6 = arith.addf %3, %5 : vector<8x256xf32>
    %c0_5 = arith.constant 0 : index
    %c0_6 = arith.constant 0 : index
    %7 = vector.load %arg2[%c0_5, %c0_6] : memref<8x256xf32, #tpu.memory_space<vmem>>, vector<8x256xf32>
    %8 = arith.addf %6, %7 : vector<8x256xf32>
    %cst = arith.constant 0.000000e+00 : f32
    %9 = vector.broadcast %cst : f32 to vector<8x256xf32>
    %10 = arith.maximumf %8, %9 : vector<8x256xf32>
    %c0_7 = arith.constant 0 : index
    %c0_8 = arith.constant 0 : index
    %11 = vector.load %arg5[%c0_7, %c0_8] : memref<8x256xf32, #tpu.memory_space<vmem>>, vector<8x256xf32>
    tpu.vector_store %arg5[%c0_7, %c0_8], %10 {strides = array<i32>} : memref<8x256xf32, #tpu.memory_space<vmem>>, vector<8x256xf32>,
    return
  }
  func.func @transform_0(%arg0: i32) -> (i32, i32) {
    %c0_i32 = arith.constant 0 : i32
    %c0_i32_0 = arith.constant 0 : i32
    return %arg0, %c0_i32 : i32, i32
  }
  func.func @transform_1(%arg0: i32) -> (i32, i32) {
    %c0_i32 = arith.constant 0 : i32
    %c0_i32_0 = arith.constant 0 : i32
    return %arg0, %c0_i32 : i32, i32
  }
  func.func @transform_2(%arg0: i32) -> (i32, i32) {
    %c0_i32 = arith.constant 0 : i32
    %c0_i32_0 = arith.constant 0 : i32
    %c0_i32_1 = arith.constant 0 : i32
    return %c0_i32, %c0_i32_0 : i32, i32
  }
  func.func @transform_3(%arg0: i32) -> (i32, i32) {
    %c0_i32 = arith.constant 0 : i32
    %c0_i32_0 = arith.constant 0 : i32
    %c0_i32_1 = arith.constant 0 : i32
    return %c0_i32, %c0_i32_0 : i32, i32
  }
  func.func @transform_4(%arg0: i32) -> (i32, i32) {
    %c0_i32 = arith.constant 0 : i32
    %c0_i32_0 = arith.constant 0 : i32
    return %arg0, %c0_i32 : i32, i32
  }
}

</mosaic_0001>

<bundles_post_ra>
// kernel: bottleneck_pallas.4
= control target key start
LH: loop header
LB: loop body
LE: loop exit
PB: predicated region body
PF: predicated region fallthrough
CT: control target
= control target key end

     0   :  { %9 = vsyncpa [#allocation3], 0  ;;  %s854_s0 = inlined_call_operand.hbm [shape: f32[128,32], index: 0, kind: input, shape index: {}]   ;;  %s855_s1 = inlined_call_operand.vmem [shape: bf16[32,8], index: 1, kind: input, shape index: {}]   ;;  %s856_s2 = inlined_call_operand.vmem [shape: bf16[128,8], index: 2, kind: output, shape index: {0}]   ;;  %s857_s3 = inlined_call_operand.vmem [shape: f32[2,8,8], index: 3, kind: output, shape index: {1}]  }
   0x1   :  { %11 = vsyncpa [#allocation3 + $0x1], 0  ;;  %s697_s12 = smov 0   ;;  %s699_s13 = smov 0  }
   0x2   :  { %s701_s14 = smov 0   ;;  %s703_s15 = smov 0  }
   0x3 LB: > { %s716_s16 = sadd.s32 4294967295, %s672_s15   ;;  %s719_s17 = sadd.s32 1, %s672_s15   ;;  %s672_s15 = sphi %s703_s15, %s864_s15   ;;  %s668_s14 = sphi %s701_s14, %s863_s14   ;;  %s664_s13 = sphi %s699_s13, %s862_s13   ;;  %s660_s12 = sphi %s697_s12, %s861_s12  }
   0x4   : > { %s21_s18 = ssub.s32 %s672_s15, %s719_s17  ;;  %s24_s19 = sadd.s32 1, %s668_s14 }
   0x5   : > { %p22_p0 = scmp.eq.s32.totalorder %s21_s18, 0  ;;  %p31_p1 = scmp.ne.s32.totalorder %s668_s14, %s664_s13 }
   0x6   : > { %p32_p2 = scmp.eq.s32.totalorder %s672_s15, 0  ;;  %p37_p3 = scmp.ne.s32.totalorder %s664_s13, %s660_s12 }
   0x7   : > { %s729_s20 = scalar_select %p22_p0, %s668_s14, %s24_s19  }
   0x8   : > { %p33_p4 = por %p32_p2, %p31_p1  ;;  %p38_p5 = scmp.eq.s32.totalorder %s716_s16, 0 }
   0x9   : > { %p571_p6 = scmp.lt.s32.totalorder %s672_s15, 2  ;;  %s137_s22 = sand.u32 1, %s668_s14  }
   0xa   : > { %p733_p7 = por %p38_p5, %p37_p3  ;;  %s510_s23 = sshll.u32 %s137_s22, 6 }
   0xb   : > { %s534_s24 = sshll.u32 %s672_s15, 10  ;;  %s141_s28 = scalar_lea.vmem [#allocation2], %s510_s23 }
   0xc   : > { %s742_s27 = scalar_lea.hbm %s854_s0, %s534_s24  ;;  %s148_s29 = sshll.u32 %s141_s28, 4  ;;  %s744_s29 = int_to_ptr.vmem [resolvable:$true] %s148_s29 }
   0xd   : > { %p746_p8 = pnand %p571_p6, %p33_p4  ;;  %s751_s4 = scalar_lea.sflag [#allocation3], %s137_s22 }
   0xe   : > { %s608_s5 = scalar_lea.hbm %s742_s27, 1024  ;;  %s613_s8 = scalar_lea.hbm %s854_s0, 2048 }
   0xf   : > { %p609_p10 = scmp.ne.s32.totalorder %s742_s27, %s608_s5  ;;  %p610_p11 = pneg %p746_p8 }
  0x10   : > { %p614_p0 = scmp.lt.u32.totalorder %s742_s27, %s854_s0  ;;  %p615_p1 = scmp.lt.u32.totalorder %s613_s8, %s608_s5 }
  0x11   : > { %p611_p12 = pnand %p610_p11, %p609_p10  ;;  %p617_p3 = scmp.lt.u32.totalorder %s608_s5, %s742_s27 }
  0x12   : > { %p616_p2 = por %p615_p1, %p614_p0 }
  0x13   : > { %p612_p13 = pneg %p611_p12 }
  0x14   : > { %p618_p4 = por %p617_p3, %p616_p2 }
  0x16   : > { %p619_p5 = pnand %p618_p4, %p612_p13 }
  0x18   : > { %622 = shalt.err (!%p619_p5)
}
  0x19   : > { %s623_s11 = scalar_lea.vmem %s744_s29, 1024  ;;  %s674_s12 = smov [#allocation2]  }
  0x1a   : > { %p624_p6 = scmp.ne.s32.totalorder %s744_s29, %s623_s11  ;;  %s628_s18 = sshll.u32 %s674_s12, 4  ;;  %s629_s18 = int_to_ptr.vmem [resolvable:$false] %s628_s18 }
  0x1b   : > { %s630_s19 = scalar_lea.vmem %s629_s18, 2048  ;;  %p631_p9 = scmp.lt.s32.totalorder %s744_s29, %s629_s18 }
  0x1c   : > { %p626_p10 = pnand %p624_p6, %p610_p11  ;;  %p632_p0 = scmp.lt.s32.totalorder %s630_s19, %s623_s11 }
  0x1e   : > { %p627_p12 = pneg %p626_p10  ;;  %p633_p1 = por %p632_p0, %p631_p9 }
  0x20   : > { %p634_p2 = pnand %p633_p1, %p627_p12 }
  0x22   : > { %637 = shalt.err (!%p634_p2)
}
  0x23   : > { %s675_s22 = smov 128   ;;  %s676_s23 = smov 8  }
  0x24   : > { %570 = dma.hbm_to_vmem [thread:$0]  (!%p746_p8), %s742_s27, 1024, %s744_s29, %s751_s4, %s675_s22, %s675_s22, %s676_s23  }
  0x25   : > { %p156_p11 = scmp.lt.s32.totalorder %s672_s15, 3  ;;  %p860_p13 = scmp.ge.s32.totalorder %s672_s15, 1 }
  0x27   : > { %p157_p3 = pnand %p860_p13, %p156_p11 }
  0x28   : > { %s162_s24 = sand.u32 (!%p157_p3), 1, %s664_s13  }
  0x29   : > { %160 = sbr.rel (%p157_p3) target bundleno = 305 (0x131), region = 28  ;;  %s514_s25 = sshll.u32 (!%p157_p3), %s162_s24, 6 }
  0x2a   : > { %s163_s26 = scalar_lea.sflag (!%p157_p3), [#allocation3], %s162_s24  ;;  %s166_s28 = scalar_lea.vmem (!%p157_p3), [#allocation2], %s514_s25 }
  0x30   : > { %655 = dma.done.wait (%p733_p7), %s163_s26, 1024  }
  0x31   : > { %657 = vsyncadd (%p733_p7), %s163_s26, 4294966272  ;;  %v606_v0 = vld [vmem:[%s855_s1] sm:$0xff]   ;;  %v607_v1 = vld [vmem:[%s855_s1 + $0x8] sm:$0xff]   ;;  %vm233_vm0 = vcmask 261120   ;;  %s515_s15 = sshll.u32 %s716_s16, 3  ;;  %vm343_vm1 = vcmask 60416  }
  0x32   : > { %549 = vmatprep.subr.bf16.mxu0 %v606_v0  ;;  %561 = vmatprep.subr.bf16.mxu1 %v606_v0  ;;  %v205_v2 = vld [vmem:[%s166_s28] sm:$0xff]  ;;  %v206_v3 = vld [vmem:[%s166_s28 + $0x8] sm:$0xff]  ;;  %v207_v4 = vld [vmem:[%s166_s28 + $0x10] sm:$0xff]  ;;  %p195_p7 = scmp.lt.s32.totalorder %s515_s15, 15  ;;  %vm352_vm2 = vcmask 64512   ;;  %p200_p8 = scmp.lt.s32.totalorder %s716_s16, 1 }
  0x33   : > { %550 = vmatpush3.bf16.msra.mxu0 %v606_v0  ;;  %563 = vmatpush3.bf16.msra.mxu1 %v606_v0  ;;  %v213_v5 = vpack.c.bf16 %v206_v3, %v205_v2  ;;  %v208_v6 = vld [vmem:[%s166_s28 + $0x18] sm:$0xff]  ;;  %v209_v7 = vld [vmem:[%s166_s28 + $0x20] sm:$0xff]  ;;  %v210_v8 = vld [vmem:[%s166_s28 + $0x28] sm:$0xff]  ;;  %vm403_vm3 = vcmask 1040384   ;;  %vm405_vm4 = vcmask 1041408  }
  0x34   : > { %551 = vmatprep.subr.bf16.mxu0 %v607_v1  ;;  %562 = vmatprep.subr.bf16.mxu1 %v607_v1  ;;  %v215_v9 = vpack.c.bf16 %v210_v8, %v209_v7  ;;  %v211_v10 = vld [vmem:[%s166_s28 + $0x30] sm:$0xff]  ;;  %v212_v11 = vld [vmem:[%s166_s28 + $0x38] sm:$0xff]  ;;  %v214_v12 = vpack.c.bf16 %v208_v6, %v207_v4  ;;  %s866_s15 = smov (!%p195_p7, %s515_s15), 15  ;;  %s868_s16 = smov (!%p200_p8, %s716_s16), 1 }
  0x35   : > { %553 = vmatprep.mubr.msk.bf16.mxu0 %vm233_vm0, %v213_v5  ;;  %v216_v13 = vpack.c.bf16 %v212_v11, %v211_v10  ;;  %s516_s21 = sshll.u32 %s866_s15, 2  ;;  %s517_s8 = sshll.u32 %s868_s16, 3 }
  0x36   : > { %557 = vmatprep.mubr.msk.bf16.mxu1 %vm233_vm0, %v215_v9  ;;  %s801_s7 = scalar_lea.vmem %s856_s2, %s516_s21  ;;  %s203_s11 = scalar_lea.vmem %s857_s3, %s517_s8 }
  0x37   : > { %552 = vmatpush3.bf16.msra.mxu0 %v607_v1  ;;  %564 = vmatpush3.bf16.msra.mxu1 %v607_v1 }
  0x3a   : > { %554 = vmatmul.mubr.msk.bf16.vlgmr.msra.gmra.mrb[0].mxu0 %vm233_vm0, %v214_v12  ;;  %558 = vmatmul.mubr.msk.bf16.vlgmr.msra.gmra.mrb[0].mxu1 %vm233_vm0, %v216_v13 }
 0x10d   : > { %v555_v14 = vpop.f32.mrb[0].mxu0  ;;  %v559_v15 = vpop.f32.mrb[0].mxu1 }
 0x10e   : > { %v537_v16 = vpack.c.bf16 %v555_v14, %v555_v14  ;;  %v280_v17 = vpop.f32.mrb[1].mxu0  ;;  %v541_v18 = vpack.c.bf16 %v559_v15, %v559_v15  ;;  %v296_v19 = vpop.f32.mrb[1].mxu1  ;;  %v376_v24 = vmul.f32 %v555_v14, %v555_v14  ;;  %v356_v32 = vsel %vm352_vm2, %v555_v14, 0.0 }
 0x10f   : > { %v535_v20 = vpack.c.bf16 %v280_v17, %v280_v17  ;;  %v374_v21 = vmul.f32 %v280_v17, %v280_v17  ;;  %v556_v22 = vpop.f32.mrb[2].mxu0  ;;  %v560_v23 = vpop.f32.mrb[2].mxu1  ;;  %v353_v28 = vsel %vm352_vm2, %v280_v17, 0.0  ;;  %v539_v35 = vpack.c.bf16 %v296_v19, %v296_v19 }
 0x110   : > { %346 = vst.msk [vmem:[%s801_s7 + $0x8] sm:$0xf] %vm343_vm1, %v537_v16  ;;  %v538_v25 = vpack.c.bf16 %v556_v22, %v556_v22  ;;  %v283_v26 = vpop.f32.mrb[3].mxu0  ;;  %350 = vst.msk [vmem:[%s801_s7 + $0x18] sm:$0xf] %vm343_vm1, %v541_v18  ;;  %v299_v27 = vpop.f32.mrb[3].mxu1  ;;  %v377_v33 = vmul.f32 %v556_v22, %v556_v22  ;;  %v378_v38 = vmul.f32 %v296_v19, %v296_v19 }
 0x111   : > { %344 = vst.msk [vmem:[%s801_s7] sm:$0xf] %vm343_vm1, %v535_v20  ;;  %v536_v29 = vpack.c.bf16 %v283_v26, %v283_v26  ;;  %v354_v30 = vsel %vm352_vm2, %v283_v26, 0.0  ;;  %v375_v31 = vmul.f32 %v283_v26, %v283_v26  ;;  %v382_v36 = vsel %vm352_vm2, %v374_v21, 0.0  ;;  %348 = vst.msk [vmem:[%s801_s7 + $0x10] sm:$0xf] %vm343_vm1, %v539_v35 }
 0x112   : > { %347 = vst.msk [vmem:[%s801_s7 + $0xc] sm:$0xf] %vm343_vm1, %v538_v25  ;;  %v355_v34 = vadd.f32 %v354_v30, %v353_v28  ;;  %v542_v39 = vpack.c.bf16 %v560_v23, %v560_v23  ;;  %v385_v42 = vsel %vm352_vm2, %v376_v24, 0.0  ;;  %v358_v43 = vsel %vm352_vm2, %v556_v22, 0.0 }
 0x113   : > { %345 = vst.msk [vmem:[%s801_s7 + $0x4] sm:$0xf] %vm343_vm1, %v536_v29  ;;  %v383_v37 = vsel %vm352_vm2, %v375_v31, 0.0  ;;  %v360_v44 = vsel %vm352_vm2, %v296_v19, 0.0  ;;  %v540_v45 = vpack.c.bf16 %v299_v27, %v299_v27  ;;  %v387_v48 = vsel %vm352_vm2, %v377_v33, 0.0 }
 0x114   : > { %v357_v40 = vadd.f32 %v356_v32, %v355_v34  ;;  %v384_v41 = vadd.f32 %v383_v37, %v382_v36  ;;  %351 = vst.msk [vmem:[%s801_s7 + $0x1c] sm:$0xf] %vm343_vm1, %v542_v39  ;;  %v389_v49 = vsel %vm352_vm2, %v378_v38, 0.0  ;;  %v379_v50 = vmul.f32 %v299_v27, %v299_v27 }
 0x115   : > { %349 = vst.msk [vmem:[%s801_s7 + $0x14] sm:$0xf] %vm343_vm1, %v540_v45  ;;  %v380_v53 = vmul.f32 %v559_v15, %v559_v15  ;;  %v362_v54 = vsel %vm352_vm2, %v299_v27, 0.0  ;;  %v364_v57 = vsel %vm352_vm2, %v559_v15, 0.0  ;;  %v381_v58 = vmul.f32 %v560_v23, %v560_v23 }
 0x116   : > { %v386_v46 = vadd.f32 %v385_v42, %v384_v41  ;;  %v359_v47 = vadd.f32 %v358_v43, %v357_v40  ;;  %v391_v59 = vsel %vm352_vm2, %v379_v50, 0.0  ;;  %v366_v63 = vsel %vm352_vm2, %v560_v23, 0.0 }
 0x117   : > { %v393_v62 = vsel %vm352_vm2, %v380_v53, 0.0  ;;  %v395_v2 = vsel %vm352_vm2, %v381_v58, 0.0 }
 0x118   : > { %v361_v51 = vadd.f32 %v360_v44, %v359_v47  ;;  %v388_v52 = vadd.f32 %v387_v48, %v386_v46 }
 0x11a   : > { %v390_v55 = vadd.f32 %v389_v49, %v388_v52  ;;  %v363_v56 = vadd.f32 %v362_v54, %v361_v51 }
 0x11c   : > { %v365_v60 = vadd.f32 %v364_v57, %v363_v56  ;;  %v392_v61 = vadd.f32 %v391_v59, %v390_v55 }
 0x11e   : > { %v367_v0 = vadd.f32 %v366_v63, %v365_v60  ;;  %v394_v1 = vadd.f32 %v393_v62, %v392_v61 }
 0x120   : > { %v368_v3 = vrot.slane %v367_v0, 4  ;;  %v396_v4 = vadd.f32 %v395_v2, %v394_v1 }
 0x122   : > { %v369_v5 = vadd.f32 %v368_v3, %v367_v0  ;;  %v397_v6 = vrot.slane %v396_v4, 4 }
 0x124   : > { %v370_v7 = vrot.slane %v369_v5, 2  ;;  %v398_v8 = vadd.f32 %v397_v6, %v396_v4 }
 0x126   : > { %v371_v9 = vadd.f32 %v370_v7, %v369_v5  ;;  %v399_v10 = vrot.slane %v398_v8, 2 }
 0x128   : > { %v372_v11 = vrot.slane %v371_v9, 1  ;;  %v400_v12 = vadd.f32 %v399_v10, %v398_v8 }
 0x12a   : > { %v401_v13 = vrot.slane %v400_v12, 1  ;;  %v373_v14 = vadd.f32 %v372_v11, %v371_v9 }
 0x12c   : > { %v402_v15 = vadd.f32 %v401_v13, %v400_v12 }
 0x12e   : > { %v404_v16 = vsel %vm403_vm3, %v373_v14, %v402_v15 }
 0x12f   : > { %v406_v17 = vsel %vm405_vm4, %v404_v16, 0.0 }
 0x130   : > { %407 = vst.msk [vmem:[%s203_s11] sm:$0xff] %vm352_vm2, %v406_v17 }
 0x131 PF: > { %p14_p9 = scmp.ge.s32.totalorder %s719_s17, 4   ;;  %s861_s12 = smov %s664_s13 }
 0x132   : > { %s862_s13 = smov %s668_s14  ;;  %s863_s14 = smov %s729_s20 }
 0x133   : > { %s864_s15 = smov %s719_s17  ;;  %16 = sbr.rel (!%p14_p9) target bundleno = 3 (0x3), region = 80 }
 0x13a   :  { %444 = vsyncpa [#allocation3], 1 }
 0x13b   :  { %446 = vsyncpa [#allocation3 + $0x1], 1 }

// kernel: bottleneck_pallas.6
= control target key start
LH: loop header
LB: loop body
LE: loop exit
PB: predicated region body
PF: predicated region fallthrough
CT: control target
= control target key end

     0   :  { %s634_s18 = smov 0   ;;  %s701_s0 = inlined_call_operand.vmem [shape: bf16[128,8], index: 0, kind: input, shape index: {}]   ;;  %s702_s1 = inlined_call_operand.vmem [shape: f32[1,8], index: 1, kind: input, shape index: {}]   ;;  %s703_s2 = inlined_call_operand.vmem [shape: f32[1,8], index: 2, kind: input, shape index: {}]   ;;  %s704_s3 = inlined_call_operand.vmem [shape: bf16[8,32], index: 3, kind: input, shape index: {}]   ;;  %s705_s4 = inlined_call_operand.vmem [shape: f32[128,32], index: 4, kind: output, shape index: {0}]   ;;  %s706_s5 = inlined_call_operand.vmem [shape: f32[2,8,32], index: 5, kind: output, shape index: {1}]  }
   0x1 LB: > { %s640_s19 = sadd.s32 4294967295, %s602_s18   ;;  %p536_p0 = scmp.ge.s32.totalorder %s602_s18, 1  ;;  %s602_s18 = sphi %s634_s18, %s16_s18  }
   0x2   : > { %p191_p1 = scmp.lt.s32.totalorder %s602_s18, 3 }
   0x4   : > { %p192_p2 = pnand %p536_p0, %p191_p1 }
   0x5   : > { %v298_v0 = vld [vmem:[%s704_s3] sm:$0xf] (!%p192_p2)  ;;  %vm312_vm0 = vcmask (!%p192_p2), 1043456   ;;  %s537_s22 = sshll.u32 (!%p192_p2), %s640_s19, 3  ;;  %vm299_vm1 = vcmask (!%p192_p2), 64512   ;;  %vm381_vm2 = vcmask (!%p192_p2), 261120  }
   0x6   : > { %195 = sbr.rel (%p192_p2) target bundleno = 275 (0x113), region = 36  ;;  %586 = vmatprep.subr.msk.bf16.mxu0 (!%p192_p2), %vm312_vm0, %v298_v0  ;;  %v314_v1 = vsel (!%p192_p2), %vm312_vm0, %v298_v0, 0  ;;  %p224_p3 = scmp.lt.s32.totalorder (!%p192_p2), %s537_s22, 15  ;;  %587 = vmatprep.subr.msk.bf16.mxu1 (!%p192_p2), %vm312_vm0, %v298_v0  ;;  %v542_v2 = vld [vmem:[%s702_s1] ss:$0 sm:$0xff] (!%p192_p2)  ;;  %vm440_vm3 = vcmask (!%p192_p2), 1040384  }
   0x7   : > { %575 = vmatpush3.bf16.msra.mxu0 (!%p192_p2), %v314_v1  ;;  %585 = vmatpush3.bf16.msra.mxu1 (!%p192_p2), %v314_v1  ;;  %v543_v11 = vld [vmem:[%s703_s2] ss:$0 sm:$0xff] (!%p192_p2)  ;;  %p235_p4 = scmp.lt.s32.totalorder (!%p192_p2), %s640_s19, 1  ;;  %vm442_vm4 = vcmask (!%p192_p2), 1041408  }
   0xd   : > { %s708_s22 = smov (!%p224_p3, %s537_s22), 15  ;;  %s710_s19 = smov (!%p235_p4, %s640_s19), 1 }
   0xe   : > { %s538_s23 = sshll.u32 %s708_s22, 2  ;;  %s540_s6 = sshll.u32 %s708_s22, 3 }
   0xf   : > { %s227_s26 = scalar_lea.vmem %s701_s0, %s538_s23  ;;  %s233_s9 = scalar_lea.vmem %s705_s4, %s540_s6 }
  0x10   : > { %v551_v3 = vld [vmem:[%s227_s26] sm:$0xff]   ;;  %v566_v4 = vld [vmem:[%s227_s26 + $0x8] sm:$0xff]   ;;  %v567_v5 = vld [vmem:[%s227_s26 + $0x10] sm:$0xff]   ;;  %s541_s10 = sshll.u32 %s710_s19, 3 }
  0x11   : > { %v552_v6 = vunpack.c.l.bf16 %v551_v3  ;;  %v553_v7 = vunpack.c.h.bf16 %v551_v3  ;;  %v556_v8 = vunpack.c.l.bf16 %v566_v4  ;;  %v557_v9 = vunpack.c.h.bf16 %v566_v4  ;;  %v568_v10 = vld [vmem:[%s227_s26 + $0x18] sm:$0xff]   ;;  %s238_s13 = scalar_lea.vmem %s706_s5, %s541_s10 }
  0x12   : > { %v560_v12 = vunpack.c.l.bf16 %v567_v5  ;;  %v561_v13 = vunpack.c.h.bf16 %v567_v5  ;;  %v564_v14 = vunpack.c.l.bf16 %v568_v10  ;;  %v565_v15 = vunpack.c.h.bf16 %v568_v10 }
  0x13   : > { %v263_v16 = vmul.f32 %v552_v6, %v542_v2  ;;  %v264_v17 = vmul.f32 %v553_v7, %v542_v2  ;;  %v265_v18 = vmul.f32 %v556_v8, %v542_v2  ;;  %v266_v19 = vmul.f32 %v557_v9, %v542_v2 }
  0x14   : > { %v267_v20 = vmul.f32 %v560_v12, %v542_v2  ;;  %v268_v21 = vmul.f32 %v561_v13, %v542_v2  ;;  %v269_v22 = vmul.f32 %v564_v14, %v542_v2  ;;  %v270_v23 = vmul.f32 %v565_v15, %v542_v2 }
  0x15   : > { %v278_v24 = vadd.f32 %v543_v11, %v263_v16  ;;  %v279_v25 = vadd.f32 %v543_v11, %v264_v17  ;;  %v280_v26 = vadd.f32 %v543_v11, %v265_v18  ;;  %v281_v27 = vadd.f32 %v543_v11, %v266_v19 }
  0x16   : > { %v282_v28 = vadd.f32 %v543_v11, %v267_v20  ;;  %v283_v29 = vadd.f32 %v543_v11, %v268_v21  ;;  %v284_v30 = vadd.f32 %v543_v11, %v269_v22  ;;  %v285_v31 = vadd.f32 %v543_v11, %v270_v23 }
  0x17   : > { %v286_v32 = vmax.f32 %v278_v24, 0.0  ;;  %v287_v33 = vmax.f32 %v279_v25, 0.0  ;;  %v288_v34 = vmax.f32 %v280_v26, 0.0  ;;  %v289_v35 = vmax.f32 %v281_v27, 0.0 }
  0x18   : > { %v290_v36 = vmax.f32 %v282_v28, 0.0  ;;  %v291_v37 = vmax.f32 %v283_v29, 0.0  ;;  %v292_v38 = vmax.f32 %v284_v30, 0.0  ;;  %v293_v39 = vmax.f32 %v285_v31, 0.0 }
  0x19   : > { %v294_v40 = vpack.c.bf16 %v287_v33, %v286_v32  ;;  %v295_v41 = vpack.c.bf16 %v289_v35, %v288_v34 }
  0x1a   : > { %v296_v42 = vpack.c.bf16 %v291_v37, %v290_v36  ;;  %v297_v43 = vpack.c.bf16 %v293_v39, %v292_v38 }
  0x1b   : > { %576 = vmatprep.mubr.msk.bf16.mxu0 %vm299_vm1, %v294_v40 }
  0x1c   : > { %577 = vmatmul.mubr.msk.bf16.vlgmr.msra.gmra.mrb[0].mxu0 %vm299_vm1, %v295_v41  ;;  %580 = vmatprep.mubr.msk.bf16.mxu1 %vm299_vm1, %v296_v42 }
  0x1d   : > { %581 = vmatmul.mubr.msk.bf16.vlgmr.msra.gmra.mrb[0].mxu1 %vm299_vm1, %v297_v43 }
  0xef   : > { %v578_v44 = vpop.f32.mrb[0].mxu0 }
  0xf0   : > { %384 = vst.msk [vmem:[%s233_s9 + $0x10] sm:$0xff] %vm381_vm2, %v578_v44  ;;  %v350_v45 = vpop.f32.mrb[1].mxu0  ;;  %v582_v46 = vpop.f32.mrb[0].mxu1  ;;  %v413_v52 = vmul.f32 %v578_v44, %v578_v44  ;;  %v393_v57 = vsel %vm381_vm2, %v578_v44, 0.0 }
  0xf1   : > { %382 = vst.msk [vmem:[%s233_s9] sm:$0xff] %vm381_vm2, %v350_v45  ;;  %v411_v47 = vmul.f32 %v350_v45, %v350_v45  ;;  %v579_v48 = vpop.f32.mrb[2].mxu0  ;;  %388 = vst.msk [vmem:[%s233_s9 + $0x30] sm:$0xff] %vm381_vm2, %v582_v46  ;;  %v366_v49 = vpop.f32.mrb[1].mxu1  ;;  %v390_v53 = vsel %vm381_vm2, %v350_v45, 0.0  ;;  %v417_v11 = vmul.f32 %v582_v46, %v582_v46  ;;  %v401_v15 = vsel %vm381_vm2, %v582_v46, 0.0 }
  0xf2   : > { %385 = vst.msk [vmem:[%s233_s9 + $0x18] sm:$0xff] %vm381_vm2, %v579_v48  ;;  %v353_v50 = vpop.f32.mrb[3].mxu0  ;;  %386 = vst.msk [vmem:[%s233_s9 + $0x20] sm:$0xff] %vm381_vm2, %v366_v49  ;;  %v583_v51 = vpop.f32.mrb[2].mxu1  ;;  %v414_v60 = vmul.f32 %v579_v48, %v579_v48  ;;  %v415_v62 = vmul.f32 %v366_v49, %v366_v49  ;;  %v422_v1 = vsel %vm381_vm2, %v413_v52, 0.0  ;;  %v395_v2 = vsel %vm381_vm2, %v579_v48, 0.0 }
  0xf3   : > { %383 = vst.msk [vmem:[%s233_s9 + $0x8] sm:$0xff] %vm381_vm2, %v353_v50  ;;  %v391_v54 = vsel %vm381_vm2, %v353_v50, 0.0  ;;  %v412_v55 = vmul.f32 %v353_v50, %v353_v50  ;;  %389 = vst.msk [vmem:[%s233_s9 + $0x38] sm:$0xff] %vm381_vm2, %v583_v51  ;;  %v369_v56 = vpop.f32.mrb[3].mxu1  ;;  %v419_v59 = vsel %vm381_vm2, %v411_v47, 0.0  ;;  %v397_v3 = vsel %vm381_vm2, %v366_v49, 0.0 }
  0xf4   : > { %v392_v58 = vadd.f32 %v391_v54, %v390_v53  ;;  %387 = vst.msk [vmem:[%s233_s9 + $0x28] sm:$0xff] %vm381_vm2, %v369_v56  ;;  %v424_v6 = vsel %vm381_vm2, %v414_v60, 0.0  ;;  %v426_v7 = vsel %vm381_vm2, %v415_v62, 0.0  ;;  %v416_v8 = vmul.f32 %v369_v56, %v369_v56 }
  0xf5   : > { %v420_v61 = vsel %vm381_vm2, %v412_v55, 0.0  ;;  %v399_v12 = vsel %vm381_vm2, %v369_v56, 0.0  ;;  %v418_v16 = vmul.f32 %v583_v51, %v583_v51  ;;  %v430_v20 = vsel %vm381_vm2, %v417_v11, 0.0 }
  0xf6   : > { %v394_v63 = vadd.f32 %v393_v57, %v392_v58  ;;  %v421_v0 = vadd.f32 %v420_v61, %v419_v59  ;;  %v428_v17 = vsel %vm381_vm2, %v416_v8, 0.0  ;;  %v403_v21 = vsel %vm381_vm2, %v583_v51, 0.0 }
  0xf7   : > { %v432_v24 = vsel %vm381_vm2, %v418_v16, 0.0 }
  0xf8   : > { %v423_v4 = vadd.f32 %v422_v1, %v421_v0  ;;  %v396_v5 = vadd.f32 %v395_v2, %v394_v63 }
  0xfa   : > { %v398_v9 = vadd.f32 %v397_v3, %v396_v5  ;;  %v425_v10 = vadd.f32 %v424_v6, %v423_v4 }
  0xfc   : > { %v427_v13 = vadd.f32 %v426_v7, %v425_v10  ;;  %v400_v14 = vadd.f32 %v399_v12, %v398_v9 }
  0xfe   : > { %v402_v18 = vadd.f32 %v401_v15, %v400_v14  ;;  %v429_v19 = vadd.f32 %v428_v17, %v427_v13 }
 0x100   : > { %v404_v22 = vadd.f32 %v403_v21, %v402_v18  ;;  %v431_v23 = vadd.f32 %v430_v20, %v429_v19 }
 0x102   : > { %v405_v25 = vrot.slane %v404_v22, 4  ;;  %v433_v26 = vadd.f32 %v432_v24, %v431_v23 }
 0x104   : > { %v406_v27 = vadd.f32 %v405_v25, %v404_v22  ;;  %v434_v28 = vrot.slane %v433_v26, 4 }
 0x106   : > { %v407_v29 = vrot.slane %v406_v27, 2  ;;  %v435_v30 = vadd.f32 %v434_v28, %v433_v26 }
 0x108   : > { %v408_v31 = vadd.f32 %v407_v29, %v406_v27  ;;  %v436_v32 = vrot.slane %v435_v30, 2 }
 0x10a   : > { %v409_v33 = vrot.slane %v408_v31, 1  ;;  %v437_v34 = vadd.f32 %v436_v32, %v435_v30 }
 0x10c   : > { %v438_v35 = vrot.slane %v437_v34, 1  ;;  %v410_v36 = vadd.f32 %v409_v33, %v408_v31 }
 0x10e   : > { %v439_v37 = vadd.f32 %v438_v35, %v437_v34 }
 0x110   : > { %v441_v38 = vsel %vm440_vm3, %v410_v36, %v439_v37 }
 0x111   : > { %v443_v39 = vsel %vm442_vm4, %v441_v38, 0.0 }
 0x112   : > { %444 = vst.msk [vmem:[%s238_s13] sm:$0xff] %vm381_vm2, %v443_v39 }
 0x113 PF: > { %s16_s18 = sadd.s32 1, %s602_s18  }
 0x114   : > { %p13_p5 = scmp.ge.s32.totalorder %s16_s18, 4  }
 0x116   :  { %15 = sbr.rel (!%p13_p5) target bundleno = 1 (0x1), region = 78 }

// kernel: bottleneck_pallas.7
= control target key start
LH: loop header
LB: loop body
LE: loop exit
PB: predicated region body
PF: predicated region fallthrough
CT: control target
= control target key end

     0   :  { %s380_s15 = smov 0   ;;  %s406_s0 = inlined_call_operand.vmem [shape: f32[16,256], index: 0, kind: input, shape index: {}]   ;;  %s407_s1 = inlined_call_operand.vmem [shape: f32[16,256], index: 1, kind: input, shape index: {}]   ;;  %s408_s2 = inlined_call_operand.vmem [shape: f32[1,256], index: 2, kind: input, shape index: {}]   ;;  %s409_s3 = inlined_call_operand.vmem [shape: f32[1,256], index: 3, kind: input, shape index: {}]   ;;  %s410_s4 = inlined_call_operand.vmem [shape: f32[16,256], index: 4, kind: output, shape index: {}]  }
   0x1 LB: > { %s323_s16 = sadd.s32 4294967295, %s353_s15   ;;  %p327_p0 = scmp.ge.s32.totalorder %s353_s15, 1  ;;  %s353_s15 = sphi %s380_s15, %s14_s15  }
   0x2   : > { %p172_p1 = scmp.lt.s32.totalorder %s353_s15, 3 }
   0x4   : > { %p173_p2 = pnand %p327_p0, %p172_p1 }
   0x5   : > { %p203_p3 = scmp.lt.s32.totalorder (!%p173_p2), %s323_s16, 1  ;;  %v222_v0 = vlaneseq (!%p173_p2)  ;;  %v220_v2 = vld [vmem:[%s408_s2] sm:$0x3] (!%p173_p2) }
   0x6   : > { %176 = sbr.rel (%p173_p2) target bundleno = 26 (0x1a), region = 36  ;;  %v234_v3 = vld [vmem:[%s409_s3] sm:$0x3] (!%p173_p2) }
   0x7   : > { %v223_v1 = vshrl.u32 (!%p173_p2), %v222_v0, 7 }
   0x9   : > { %v224_v4 = vsub.s32 (!%p173_p2), 0, %v223_v1  ;;  %v228_v5 = vsub.s32 (!%p173_p2), 1, %v223_v1 }
   0xb   : > { %v225_v8 = vrot.slane (!%p173_p2), %v220_v2, %v224_v4  ;;  %v239_v9 = vrot.slane (!%p173_p2), %v234_v3, %v224_v4  ;;  %v229_v10 = vrot.slane (!%p173_p2), %v220_v2, %v228_v5  ;;  %v243_v11 = vrot.slane (!%p173_p2), %v234_v3, %v228_v5 }
   0xd   : > { %s412_s16 = smov (!%p203_p3, %s323_s16), 1 }
   0xe   : > { %s336_s21 = sshll.u32 %s412_s16, 4 }
   0xf   : > { %s207_s24 = scalar_lea.vmem %s406_s0, %s336_s21  ;;  %s212_s27 = scalar_lea.vmem %s407_s1, %s336_s21 }
  0x10   : > { %v218_v6 = vld [vmem:[%s207_s24] sm:$0xff]  ;;  %v219_v7 = vld [vmem:[%s207_s24 + $0x8] sm:$0xff]  ;;  %s217_s30 = scalar_lea.vmem %s410_s4, %s336_s21 }
  0x11   : > { %v232_v12 = vmul.f32 %v225_v8, %v218_v6  ;;  %v233_v13 = vmul.f32 %v229_v10, %v219_v7  ;;  %v248_v14 = vld [vmem:[%s212_s27] sm:$0xff]  ;;  %v249_v15 = vld [vmem:[%s212_s27 + $0x8] sm:$0xff] }
  0x13   : > { %v246_v16 = vadd.f32 %v239_v9, %v232_v12  ;;  %v247_v17 = vadd.f32 %v243_v11, %v233_v13 }
  0x15   : > { %v250_v18 = vadd.f32 %v248_v14, %v246_v16  ;;  %v251_v19 = vadd.f32 %v249_v15, %v247_v17 }
  0x17   : > { %v252_v20 = vmax.f32 %v250_v18, 0.0  ;;  %v253_v21 = vmax.f32 %v251_v19, 0.0 }
  0x19   : > { %254 = vst [vmem:[%s217_s30] sm:$0xff] %v252_v20  ;;  %255 = vst [vmem:[%s217_s30 + $0x8] sm:$0xff] %v253_v21 }
  0x1a PF: > { %s14_s15 = sadd.s32 1, %s353_s15  }
  0x1b   : > { %p11_p4 = scmp.ge.s32.totalorder %s14_s15, 4  }
  0x1d   :  { %13 = sbr.rel (!%p11_p4) target bundleno = 1 (0x1), region = 69 }

// kernel: bottleneck_pallas.5
= control target key start
LH: loop header
LB: loop body
LE: loop exit
PB: predicated region body
PF: predicated region fallthrough
CT: control target
= control target key end

     0   :  { %s1320_s18 = smov 0   ;;  %s1580_s0 = inlined_call_operand.vmem [shape: bf16[2,8,8,8], index: 0, kind: input, shape index: {}]   ;;  %s1581_s1 = inlined_call_operand.vmem [shape: f32[1,8], index: 1, kind: input, shape index: {}]   ;;  %s1582_s2 = inlined_call_operand.vmem [shape: f32[1,8], index: 2, kind: input, shape index: {}]   ;;  %s1583_s3 = inlined_call_operand.vmem [shape: bf16[72,8], index: 3, kind: input, shape index: {}]   ;;  %s1584_s4 = inlined_call_operand.vmem [shape: bf16[2,8,8,8], index: 4, kind: output, shape index: {0}]   ;;  %s1585_s5 = inlined_call_operand.vmem [shape: f32[2,8,8], index: 5, kind: output, shape index: {1}]  }
   0x1 LB: > { %s1008_s19 = sadd.s32 4294967295, %s1279_s18   ;;  %p1012_p0 = scmp.ge.s32.totalorder %s1279_s18, 1  ;;  %s1279_s18 = sphi %s1320_s18, %s16_s18  }
   0x2   : > { %p190_p1 = scmp.lt.s32.totalorder %s1279_s18, 3 }
   0x4   : > { %p191_p2 = pnand %p1012_p0, %p190_p1 }
   0x5   : > { %p222_p3 = scmp.lt.s32.totalorder (!%p191_p2), %s1008_s19, 1  ;;  %vm291_vm0 = vcmask (!%p191_p2), 64512   ;;  %vm293_vm1 = vcmask (!%p191_p2), 58368   ;;  %vm298_vm2 = vcmask (!%p191_p2), 57344   ;;  %v1281_v0 = vmov (!%p191_p2), 0.0   ;;  %s1282_s28 = smov (!%p191_p2), 16  }
   0x6   : > { %194 = sbr.rel (%p191_p2) target bundleno = 456 (0x1c8), region = 36  ;;  %292 = vst.msk [vmem:[#allocation2] sm:$0xff] (!%p191_p2), %vm291_vm0, %v1281_v0  ;;  %296 = vst.msk [vmem:[#allocation2 + $0x90] sm:$0xff] (!%p191_p2), %vm291_vm0, %v1281_v0  ;;  %v1018_v1 = vld [vmem:[%s1581_s1] ss:$0 sm:$0xff] (!%p191_p2)  ;;  %s1283_s29 = smov (!%p191_p2), 8  }
   0x7   : > { %294 = vst.msk [vmem:[#allocation2 + $0x8] sm:$0x3] (!%p191_p2), %vm293_vm1, %v1281_v0  ;;  %297 = vst.msk [vmem:[#allocation2 + $0x98] sm:$0x3] (!%p191_p2), %vm293_vm1, %v1281_v0  ;;  %v1019_v10 = vld [vmem:[%s1582_s2] ss:$0 sm:$0xff] (!%p191_p2) }
   0x8   : > { %310 = vst.msk [vmem:[#allocation2 + $0x19] sm:$0x1] (!%p191_p2), %vm298_vm2, %v1281_v0  ;;  %300 = vst.msk [vmem:[#allocation2 + $0x10] sm:$0x1] (!%p191_p2), %vm298_vm2, %v1281_v0  ;;  %v1268_v58 = vld [vmem:[%s1583_s3] sm:$0xff] (!%p191_p2)   ;;  %v1269_v59 = vld [vmem:[%s1583_s3 + $0x8] sm:$0xff] (!%p191_p2)  }
   0x9   : > { %301 = vst.msk [vmem:[#allocation2 + $0x20] sm:$0x1] (!%p191_p2), %vm298_vm2, %v1281_v0  ;;  %302 = vst.msk [vmem:[#allocation2 + $0x30] sm:$0x1] (!%p191_p2), %vm298_vm2, %v1281_v0  ;;  %1061 = vmatprep.subr.bf16.mxu0 (!%p191_p2), %v1268_v58  ;;  %1079 = vmatprep.subr.bf16.mxu1 (!%p191_p2), %v1268_v58  ;;  %s1284_s9 = smov (!%p191_p2), 24   ;;  %v1270_v63 = vld [vmem:[%s1583_s3 + $0x10] sm:$0xff] (!%p191_p2)  }
   0xa   : > { %303 = vst.msk [vmem:[#allocation2 + $0x40] sm:$0x1] (!%p191_p2), %vm298_vm2, %v1281_v0  ;;  %304 = vst.msk [vmem:[#allocation2 + $0x50] sm:$0x1] (!%p191_p2), %vm298_vm2, %v1281_v0  ;;  %1062 = vmatpush3.bf16.msra.mxu0 (!%p191_p2), %v1268_v58  ;;  %1084 = vmatpush3.bf16.msra.mxu1 (!%p191_p2), %v1268_v58  ;;  %s1285_s12 = smov (!%p191_p2), 32   ;;  %s1286_s15 = smov (!%p191_p2), 40  }
   0xb   : > { %305 = vst.msk [vmem:[#allocation2 + $0x60] sm:$0x1] (!%p191_p2), %vm298_vm2, %v1281_v0  ;;  %306 = vst.msk [vmem:[#allocation2 + $0x70] sm:$0x1] (!%p191_p2), %vm298_vm2, %v1281_v0  ;;  %1063 = vmatprep.subr.bf16.mxu0 (!%p191_p2), %v1269_v59  ;;  %1080 = vmatprep.subr.bf16.mxu1 (!%p191_p2), %v1269_v59  ;;  %vm781_vm3 = vcmask (!%p191_p2), 1043456   ;;  %s1287_s21 = smov (!%p191_p2), 48  }
   0xc   : > { %307 = vst.msk [vmem:[#allocation2 + $0x80] sm:$0x1] (!%p191_p2), %vm298_vm2, %v1281_v0  ;;  %311 = vst.msk [vmem:[#allocation2 + $0x29] sm:$0x1] (!%p191_p2), %vm298_vm2, %v1281_v0  ;;  %s1288_s22 = smov (!%p191_p2), 56   ;;  %vm665_vm4 = vcmask (!%p191_p2), 130048  }
   0xd   : > { %s1587_s19 = smov (!%p222_p3, %s1008_s19), 1  ;;  %312 = vst.msk [vmem:[#allocation2 + $0x39] sm:$0x1] %vm298_vm2, %v1281_v0  ;;  %313 = vst.msk [vmem:[#allocation2 + $0x49] sm:$0x1] %vm298_vm2, %v1281_v0  ;;  %vm674_vm5 = vcmask 195584  }
   0xe   : > { %314 = vst.msk [vmem:[#allocation2 + $0x59] sm:$0x1] %vm298_vm2, %v1281_v0  ;;  %315 = vst.msk [vmem:[#allocation2 + $0x69] sm:$0x1] %vm298_vm2, %v1281_v0  ;;  %s1031_s20 = sshll.u32 %s1587_s19, 5  ;;  %v336_v40 = vld [vmem:[#allocation2 + $0x1] sm:$0xff]  ;;  %1064 = vmatpush3.bf16.msra.mxu0 %v1269_v59  ;;  %1085 = vmatpush3.bf16.msra.mxu1 %v1269_v59 }
   0xf   : > { %316 = vst.msk [vmem:[#allocation2 + $0x79] sm:$0x1] %vm298_vm2, %v1281_v0  ;;  %317 = vst.msk [vmem:[#allocation2 + $0x89] sm:$0x1] %vm298_vm2, %v1281_v0  ;;  %s226_s23 = scalar_lea.vmem %s1580_s0, %s1031_s20  ;;  %1065 = vmatprep.subr.bf16.mxu0 %v1270_v63  ;;  %1081 = vmatprep.subr.bf16.mxu1 %v1270_v63  ;;  %vm683_vm6 = vcmask 261120   ;;  %vm692_vm7 = vcmask 326656   ;;  %s1538_s26 = scalar_lea.vmem %s1584_s4, %s1031_s20 }
  0x10   : > { %299 = vst.msk [vmem:[#allocation2] sm:$0x1] %vm298_vm2, %v1281_v0  ;;  %309 = vst.msk [vmem:[#allocation2 + $0x9] sm:$0x1] %vm298_vm2, %v1281_v0  ;;  %v1034_v2 = vld [vmem:[%s226_s23] sm:$0xff]   ;;  %v1049_v3 = vld [vmem:[%s226_s23 + $0x8] sm:$0xff]  }
  0x11   : > { %318 = vst.msk [vmem:[#allocation2 + $0x99] sm:$0x1] %vm298_vm2, %v1281_v0  ;;  %308 = vst.msk [vmem:[#allocation2 + $0x90] sm:$0x1] %vm298_vm2, %v1281_v0  ;;  %v1050_v4 = vld [vmem:[%s226_s23 + $0x10] sm:$0xff]   ;;  %v1035_v5 = vunpack.c.l.bf16 %v1034_v2  ;;  %v1036_v6 = vunpack.c.h.bf16 %v1034_v2  ;;  %v1039_v7 = vunpack.c.l.bf16 %v1049_v3  ;;  %v1040_v8 = vunpack.c.h.bf16 %v1049_v3  ;;  %v1051_v9 = vld [vmem:[%s226_s23 + $0x18] sm:$0xff]  }
  0x12   : > { %v1043_v11 = vunpack.c.l.bf16 %v1050_v4  ;;  %v1044_v12 = vunpack.c.h.bf16 %v1050_v4  ;;  %v1047_v13 = vunpack.c.l.bf16 %v1051_v9  ;;  %v1048_v14 = vunpack.c.h.bf16 %v1051_v9  ;;  %v1271_v3 = vld [vmem:[%s1583_s3 + $0x18] sm:$0xff]   ;;  %1066 = vmatpush3.bf16.msra.mxu0 %v1270_v63  ;;  %1086 = vmatpush3.bf16.msra.mxu1 %v1270_v63  ;;  %s1289_s23 = smov 64   ;;  %s1017_s20 = sshll.u32 %s1587_s19, 3 }
  0x13   : > { %v260_v15 = vmul.f32 %v1035_v5, %v1018_v1  ;;  %v261_v16 = vmul.f32 %v1036_v6, %v1018_v1  ;;  %v262_v17 = vmul.f32 %v1039_v7, %v1018_v1  ;;  %v263_v18 = vmul.f32 %v1040_v8, %v1018_v1  ;;  %1067 = vmatprep.subr.bf16.mxu0 %v1271_v3  ;;  %v1272_v7 = vld [vmem:[%s1583_s3 + $0x20] ss:$0 sps:$4 sm:$0xff]  }
  0x14   : > { %v264_v19 = vmul.f32 %v1043_v11, %v1018_v1  ;;  %v265_v20 = vmul.f32 %v1044_v12, %v1018_v1  ;;  %v266_v21 = vmul.f32 %v1047_v13, %v1018_v1  ;;  %v267_v22 = vmul.f32 %v1048_v14, %v1018_v1  ;;  %1082 = vmatprep.subr.bf16.mxu1 %v1271_v3 }
  0x15   : > { %v275_v23 = vadd.f32 %v1019_v10, %v260_v15  ;;  %v276_v24 = vadd.f32 %v1019_v10, %v261_v16  ;;  %v277_v25 = vadd.f32 %v1019_v10, %v262_v17  ;;  %v278_v26 = vadd.f32 %v1019_v10, %v263_v18 }
  0x16   : > { %v279_v27 = vadd.f32 %v1019_v10, %v264_v19  ;;  %v280_v28 = vadd.f32 %v1019_v10, %v265_v20  ;;  %v281_v29 = vadd.f32 %v1019_v10, %v266_v21  ;;  %v282_v30 = vadd.f32 %v1019_v10, %v267_v22  ;;  %1068 = vmatpush3.bf16.msra.mxu0 %v1271_v3 }
  0x17   : > { %v283_v31 = vmax.f32 %v275_v23, 0.0  ;;  %v284_v32 = vmax.f32 %v276_v24, 0.0  ;;  %v285_v33 = vmax.f32 %v277_v25, 0.0  ;;  %v286_v34 = vmax.f32 %v278_v26, 0.0  ;;  %v344_v39 = vld [vmem:[#allocation2 + $0x2] sm:$0xff]  ;;  %1087 = vmatpush3.bf16.msra.mxu1 %v1271_v3  ;;  %1089 = vmatprep.subr.msk.bf16.mxu0 %vm781_vm3, %v1272_v7 }
  0x18   : > { %v287_v35 = vmax.f32 %v279_v27, 0.0  ;;  %v288_v36 = vmax.f32 %v280_v28, 0.0  ;;  %v289_v37 = vmax.f32 %v281_v29, 0.0  ;;  %v290_v38 = vmax.f32 %v282_v30, 0.0  ;;  %1090 = vmatprep.subr.msk.bf16.mxu1 %vm781_vm3, %v1272_v7  ;;  %v384_v29 = vld [vmem:[#allocation2 + $0x90] sm:$0xff] }
  0x19   : > { %320 = vst.msk [vmem:[#allocation2 + $0x11] sm:$0xff] %vm291_vm0, %v283_v31  ;;  %321 = vst.msk [vmem:[#allocation2 + $0x21] sm:$0xff] %vm291_vm0, %v284_v32  ;;  %v783_v9 = vsel %vm781_vm3, %v1272_v7, 0  ;;  %v392_v32 = vld [vmem:[#allocation2 + $0x91] sm:$0xff]  ;;  %vm701_vm8 = vcmask 392192   ;;  %vm710_vm9 = vcmask 457728  }
  0x1a   : > { %322 = vst.msk [vmem:[#allocation2 + $0x31] sm:$0xff] %vm291_vm0, %v285_v33  ;;  %323 = vst.msk [vmem:[#allocation2 + $0x41] sm:$0xff] %vm291_vm0, %v286_v34  ;;  %1070 = vmatpush3.bf16.msra.mxu0 %v783_v9  ;;  %v400_v34 = vld [vmem:[#allocation2 + $0x92] sm:$0xff]  ;;  %vm719_vm10 = vcmask 523264   ;;  %vm768_vm11 = vcmask 588800   ;;  %vm858_vm12 = vcmask 60416  }
  0x1b   : > { %324 = vst.msk [vmem:[#allocation2 + $0x51] sm:$0xff] %vm291_vm0, %v287_v35  ;;  %325 = vst.msk [vmem:[#allocation2 + $0x61] sm:$0xff] %vm291_vm0, %v288_v36  ;;  %1088 = vmatpush3.bf16.msra.mxu1 %v783_v9  ;;  %vm917_vm13 = vcmask 1040384   ;;  %vm919_vm14 = vcmask 1041408  }
  0x1c   : > { %326 = vst.msk [vmem:[#allocation2 + $0x71] sm:$0xff] %vm291_vm0, %v289_v37  ;;  %327 = vst.msk [vmem:[#allocation2 + $0x81] sm:$0xff] %vm291_vm0, %v290_v38 }
  0x20   : > { %v345_v41 = vld [vmem:[#allocation2 + $0x12] sm:$0xff]  ;;  %v346_v43 = vld [vmem:[#allocation2 + $0x22] sm:$0xff] }
  0x21   : > { %v337_v42 = vld [vmem:[#allocation2 + $0x11] sm:$0xff]  ;;  %v1118_v44 = vpack.i.bf16 %v345_v41, %v344_v39  ;;  %v338_v47 = vld [vmem:[#allocation2 + $0x21] sm:$0xff]  ;;  %v1148_v1 = vpack.i.bf16 %v346_v43, %v345_v41 }
  0x22   : > { %v1108_v45 = vpack.i.bf16 %v337_v42, %v336_v40  ;;  %v347_v46 = vld [vmem:[#allocation2 + $0x32] sm:$0xff]  ;;  %v1378_v52 = vld [vmem:[#allocation2 + $0x40] sm:$0xff]  ;;  %v1138_v61 = vpack.i.bf16 %v338_v47, %v337_v42 }
  0x23   : > { %v339_v48 = vld [vmem:[#allocation2 + $0x31] sm:$0xff]  ;;  %1119 = vrot.lane.b32.xlu1 %v1118_v44, %s1282_s28  ;;  %v1374_v49 = vpack.i.bf16 %v347_v46, %v346_v43  ;;  %v1382_v54 = vld [vmem:[#allocation2 + $0x20] sm:$0xff] }
  0x24   : > { %1109 = vrot.lane.b32.xlu0 %v1108_v45, %s1283_s29  ;;  %v1113_v50 = vpack.i.bf16 %v339_v48, %v338_v47  ;;  %v1376_v51 = vld [vmem:[#allocation2 + $0x30] sm:$0xff]  ;;  %v363_v57 = vld [vmem:[#allocation2 + $0x41] sm:$0xff] }
  0x25   : > { %v1380_v53 = vld [vmem:[#allocation2 + $0x10] sm:$0xff]  ;;  %v1133_v55 = vpack.i.bf16 %v1378_v52, %v1376_v51  ;;  %v1143_v60 = vpack.i.bf16 %v363_v57, %v339_v48  ;;  %v371_v62 = vld [vmem:[#allocation2 + $0x42] sm:$0xff]  ;;  %v1158_v5 = vpack.i.bf16 %v1376_v51, %v1382_v54 }
  0x26   : > { %v1128_v56 = vpack.i.bf16 %v1382_v54, %v1380_v53  ;;  %v1153_v0 = vpack.i.bf16 %v371_v62, %v347_v46  ;;  %v1404_v2 = vld [vmem:[#allocation2 + $0x50] sm:$0xff]  ;;  %v342_v10 = vld [vmem:[#allocation2 + $0x61] sm:$0xff] }
  0x27   : > { %1124 = vrot.lane.b32.xlu1 %v1374_v49, %s1282_s28  ;;  %v1163_v4 = vpack.i.bf16 %v1404_v2, %v1378_v52  ;;  %v388_v6 = vld [vmem:[#allocation2 + $0x51] sm:$0xff]  ;;  %v350_v15 = vld [vmem:[#allocation2 + $0x62] sm:$0xff] }
  0x28   : > { %1114 = vrot.lane.b32.xlu0 %v1113_v50, %s1283_s29  ;;  %v1173_v8 = vpack.i.bf16 %v388_v6, %v363_v57  ;;  %v343_v11 = vld [vmem:[#allocation2 + $0x71] sm:$0xff]  ;;  %v359_v19 = vld [vmem:[#allocation2 + $0x80] sm:$0xff]  ;;  %v1218_v25 = vpack.i.bf16 %v342_v10, %v388_v6 }
  0x29   : > { %v396_v12 = vld [vmem:[#allocation2 + $0x52] sm:$0xff]  ;;  %v1193_v13 = vpack.i.bf16 %v343_v11, %v342_v10  ;;  %v1429_v20 = vld [vmem:[#allocation2 + $0x60] sm:$0xff]  ;;  %v1243_v30 = vpack.i.bf16 %v384_v29, %v359_v19 }
  0x2a   : > { %v1188_v14 = vpack.i.bf16 %v396_v12, %v371_v62  ;;  %v351_v16 = vld [vmem:[#allocation2 + $0x72] sm:$0xff]  ;;  %v1208_v22 = vpack.i.bf16 %v1429_v20, %v1404_v2  ;;  %v367_v23 = vld [vmem:[#allocation2 + $0x81] sm:$0xff]  ;;  %v1228_v28 = vpack.i.bf16 %v350_v15, %v396_v12 }
  0x2b   : > { %1134 = vrot.lane.b32.xlu1 %v1133_v55, %s1284_s9  ;;  %v1203_v17 = vpack.i.bf16 %v351_v16, %v350_v15  ;;  %v1427_v18 = vld [vmem:[#allocation2 + $0x70] sm:$0xff]  ;;  %v1223_v24 = vpack.i.bf16 %v367_v23, %v343_v11  ;;  %v375_v26 = vld [vmem:[#allocation2 + $0x82] sm:$0xff]  ;;  %v1253_v33 = vpack.i.bf16 %v392_v32, %v367_v23 }
  0x2c   : > { %1129 = vrot.lane.b32.xlu0 %v1128_v56, %s1284_s9  ;;  %v1213_v21 = vpack.i.bf16 %v359_v19, %v1427_v18  ;;  %v1233_v27 = vpack.i.bf16 %v375_v26, %v351_v16  ;;  %v1238_v31 = vpack.i.bf16 %v1427_v18, %v1429_v20  ;;  %v1263_v35 = vpack.i.bf16 %v400_v34, %v375_v26  ;;  %v328_v46 = vld [vmem:[#allocation2] sm:$0xff] }
  0x2f   : > { %1144 = vrot.lane.b32.xlu1 %v1143_v60, %s1285_s12 }
  0x30   : > { %1139 = vrot.lane.b32.xlu0 %v1138_v61, %s1285_s12 }
  0x33   : > { %1154 = vrot.lane.b32.xlu1 %v1153_v0, %s1286_s15 }
  0x34   : > { %1149 = vrot.lane.b32.xlu0 %v1148_v1, %s1286_s15 }
  0x37   : > { %1164 = vrot.lane.b32.xlu1 %v1163_v4, %s1287_s21 }
  0x38   : > { %1159 = vrot.lane.b32.xlu0 %v1158_v5, %s1287_s21 }
  0x3b   : > { %1174 = vrot.lane.b32.xlu1 %v1173_v8, %s1288_s22 }
  0x3c   : > { %1169 = vrot.lane.b32.xlu0 %v1113_v50, %s1288_s22 }
  0x3f   : > { %1184 = vrot.lane.b32.xlu1 %v1173_v8, %s1283_s29 }
  0x40   : > { %1179 = vrot.lane.b32.xlu0 %v1374_v49, %s1289_s23 }
  0x43   : > { %1194 = vrot.lane.b32.xlu1 %v1193_v13, %s1283_s29  ;;  %s235_s29 = scalar_lea.vmem %s1585_s5, %s1017_s20 }
  0x44   : > { %1189 = vrot.lane.b32.xlu0 %v1188_v14, %s1289_s23 }
  0x47   : > { %1204 = vrot.lane.b32.xlu1 %v1203_v17, %s1282_s28 }
  0x48   : > { %1199 = vrot.lane.b32.xlu0 %v1188_v14, %s1282_s28 }
  0x4b   : > { %1214 = vrot.lane.b32.xlu1 %v1213_v21, %s1284_s9 }
  0x4c   : > { %1209 = vrot.lane.b32.xlu0 %v1208_v22, %s1284_s9 }
  0x4f   : > { %1224 = vrot.lane.b32.xlu1 %v1223_v24, %s1285_s12 }
  0x50   : > { %1219 = vrot.lane.b32.xlu0 %v1218_v25, %s1285_s12 }
  0x53   : > { %1234 = vrot.lane.b32.xlu1 %v1233_v27, %s1286_s15 }
  0x54   : > { %1229 = vrot.lane.b32.xlu0 %v1228_v28, %s1286_s15 }
  0x57   : > { %1244 = vrot.lane.b32.xlu1 %v1243_v30, %s1287_s21 }
  0x58   : > { %1239 = vrot.lane.b32.xlu0 %v1238_v31, %s1287_s21 }
  0x5b   : > { %1254 = vrot.lane.b32.xlu1 %v1253_v33, %s1288_s22 }
  0x5c   : > { %1249 = vrot.lane.b32.xlu0 %v1193_v13, %s1288_s22 }
  0x5f   : > { %1264 = vrot.lane.b32.xlu1 %v1263_v35, %s1289_s23 }
  0x60   : > { %1259 = vrot.lane.b32.xlu0 %v1203_v17, %s1289_s23 }
  0x95   : > { %v1120_v36 = vpop.permute.xlu1 %1119 }
  0x96   : > { %v1110_v37 = vpop.permute.xlu0 %1109  ;;  %v1122_v55 = vunpack.i.h.bf16 %v1120_v36  ;;  %v1121_v56 = vunpack.i.l.bf16 %v1120_v36 }
  0x97   : > { %v1112_v44 = vunpack.i.h.bf16 %v1110_v37  ;;  %v1111_v45 = vunpack.i.l.bf16 %v1110_v37 }
  0x99   : > { %v1125_v38 = vpop.permute.xlu1 %1124  ;;  %v657_v57 = vsel %vm291_vm0, %v328_v46, %v1111_v45  ;;  %v658_v58 = vsel %vm291_vm0, %v1380_v53, %v1112_v44 }
  0x9a   : > { %v1115_v39 = vpop.permute.xlu0 %1114  ;;  %v1127_v59 = vunpack.i.h.bf16 %v1125_v38  ;;  %v1126_v60 = vunpack.i.l.bf16 %v1125_v38  ;;  %v666_v6 = vsel %vm665_vm4, %v657_v57, %v1121_v56  ;;  %v667_v53 = vsel %vm665_vm4, %v658_v58, %v1122_v55 }
  0x9b   : > { %v1117_v47 = vunpack.i.h.bf16 %v1115_v39  ;;  %v1116_v48 = vunpack.i.l.bf16 %v1115_v39 }
  0x9d   : > { %v1135_v40 = vpop.permute.xlu1 %1134  ;;  %v660_v61 = vsel %vm291_vm0, %v1376_v51, %v1117_v47  ;;  %v659_v62 = vsel %vm291_vm0, %v1382_v54, %v1116_v48 }
  0x9e   : > { %v1130_v41 = vpop.permute.xlu0 %1129  ;;  %v1137_v63 = vunpack.i.h.bf16 %v1135_v40  ;;  %v1136_v0 = vunpack.i.l.bf16 %v1135_v40  ;;  %v668_v7 = vsel %vm665_vm4, %v659_v62, %v1126_v60  ;;  %v669_v51 = vsel %vm665_vm4, %v660_v61, %v1127_v59 }
  0x9f   : > { %v1132_v4 = vunpack.i.h.bf16 %v1130_v41  ;;  %v1131_v5 = vunpack.i.l.bf16 %v1130_v41 }
  0xa0   : > { %v677_v9 = vsel %vm674_vm5, %v668_v7, %v1136_v0  ;;  %v678_v10 = vsel %vm674_vm5, %v669_v51, %v1137_v63 }
  0xa1   : > { %v1450_v42 = vpop.permute.xlu1 %1144  ;;  %v675_v15 = vsel %vm674_vm5, %v666_v6, %v1131_v5  ;;  %v676_v16 = vsel %vm674_vm5, %v667_v53, %v1132_v4 }
  0xa2   : > { %v1140_v43 = vpop.permute.xlu0 %1139  ;;  %v1147_v21 = vunpack.i.h.bf16 %v1450_v42  ;;  %v1146_v22 = vunpack.i.l.bf16 %v1450_v42 }
  0xa3   : > { %v1142_v8 = vunpack.i.h.bf16 %v1140_v43  ;;  %v1141_v54 = vunpack.i.l.bf16 %v1140_v43 }
  0xa4   : > { %v686_v43 = vsel %vm683_vm6, %v677_v9, %v1146_v22  ;;  %v687_v44 = vsel %vm683_vm6, %v678_v10, %v1147_v21 }
  0xa5   : > { %v1452_v49 = vpop.permute.xlu1 %1154  ;;  %v684_v25 = vsel %vm683_vm6, %v675_v15, %v1141_v54  ;;  %v685_v26 = vsel %vm683_vm6, %v676_v16, %v1142_v8 }
  0xa6   : > { %v1150_v50 = vpop.permute.xlu0 %1149  ;;  %v1157_v27 = vunpack.i.h.bf16 %v1452_v49  ;;  %v1156_v28 = vunpack.i.l.bf16 %v1452_v49 }
  0xa7   : > { %v1152_v11 = vunpack.i.h.bf16 %v1150_v50  ;;  %v1151_v12 = vunpack.i.l.bf16 %v1150_v50 }
  0xa8   : > { %v695_v47 = vsel %vm692_vm7, %v686_v43, %v1156_v28  ;;  %v696_v48 = vsel %vm692_vm7, %v687_v44, %v1157_v27 }
  0xa9   : > { %v1165_v1 = vpop.permute.xlu1 %1164  ;;  %v693_v29 = vsel %vm692_vm7, %v684_v25, %v1151_v12  ;;  %v694_v30 = vsel %vm692_vm7, %v685_v26, %v1152_v11 }
  0xaa   : > { %v1160_v3 = vpop.permute.xlu0 %1159  ;;  %v1167_v31 = vunpack.i.h.bf16 %v1165_v1  ;;  %v1166_v32 = vunpack.i.l.bf16 %v1165_v1 }
  0xab   : > { %v1162_v17 = vunpack.i.h.bf16 %v1160_v3  ;;  %v1161_v19 = vunpack.i.l.bf16 %v1160_v3 }
  0xac   : > { %v704_v56 = vsel %vm701_vm8, %v695_v47, %v1166_v32  ;;  %v705_v57 = vsel %vm701_vm8, %v696_v48, %v1167_v31 }
  0xad   : > { %v1175_v13 = vpop.permute.xlu1 %1174  ;;  %v702_v35 = vsel %vm701_vm8, %v693_v29, %v1161_v19  ;;  %v703_v36 = vsel %vm701_vm8, %v694_v30, %v1162_v17 }
  0xae   : > { %v1170_v14 = vpop.permute.xlu0 %1169  ;;  %v1177_v39 = vunpack.i.h.bf16 %v1175_v13  ;;  %v1176_v40 = vunpack.i.l.bf16 %v1175_v13 }
  0xaf   : > { %v1172_v23 = vunpack.i.h.bf16 %v1170_v14  ;;  %v1171_v24 = vunpack.i.l.bf16 %v1170_v14 }
  0xb0   : > { %v713_v60 = vsel %vm710_vm9, %v704_v56, %v1176_v40  ;;  %v714_v61 = vsel %vm710_vm9, %v705_v57, %v1177_v39 }
  0xb1   : > { %v1185_v33 = vpop.permute.xlu1 %1184  ;;  %v711_v41 = vsel %vm710_vm9, %v702_v35, %v1171_v24  ;;  %v712_v42 = vsel %vm710_vm9, %v703_v36, %v1172_v23 }
  0xb2   : > { %v1180_v34 = vpop.permute.xlu0 %1179  ;;  %v1187_v7 = vunpack.i.h.bf16 %v1185_v33  ;;  %v1186_v51 = vunpack.i.l.bf16 %v1185_v33 }
  0xb3   : > { %v1182_v37 = vunpack.i.h.bf16 %v1180_v34  ;;  %v1181_v38 = vunpack.i.l.bf16 %v1180_v34 }
  0xb4   : > { %v662_v21 = vsel %vm291_vm0, %v1404_v2, %v1187_v7  ;;  %v661_v22 = vsel %vm291_vm0, %v1378_v52, %v1186_v51 }
  0xb5   : > { %v720_v45 = vsel %vm719_vm10, %v711_v41, %v1181_v38  ;;  %v721_v46 = vsel %vm719_vm10, %v712_v42, %v1182_v37  ;;  %v1195_v49 = vpop.permute.xlu1 %1194 }
  0xb6   : > { %v1190_v50 = vpop.permute.xlu0 %1189  ;;  %v728_v55 = vpack.c.bf16 %v721_v46, %v720_v45  ;;  %v1197_v8 = vunpack.i.h.bf16 %v1195_v49  ;;  %v1196_v54 = vunpack.i.l.bf16 %v1195_v49 }
  0xb7   : > { %v1192_v58 = vunpack.i.h.bf16 %v1190_v50  ;;  %v1191_v59 = vunpack.i.l.bf16 %v1190_v50 }
  0xb8   : > { %1071 = vmatprep.mubr.msk.bf16.mxu0 %vm768_vm11, %v728_v55  ;;  %v664_v23 = vsel %vm291_vm0, %v1427_v18, %v1197_v8  ;;  %v663_v24 = vsel %vm291_vm0, %v1429_v20, %v1196_v54 }
  0xb9   : > { %v722_v62 = vsel %vm719_vm10, %v713_v60, %v1191_v59  ;;  %v723_v63 = vsel %vm719_vm10, %v714_v61, %v1192_v58  ;;  %v1205_v1 = vpop.permute.xlu1 %1204 }
  0xba   : > { %v729_v0 = vpack.c.bf16 %v723_v63, %v722_v62  ;;  %v1200_v3 = vpop.permute.xlu0 %1199  ;;  %v1207_v9 = vunpack.i.h.bf16 %v1205_v1  ;;  %v1206_v10 = vunpack.i.l.bf16 %v1205_v1 }
  0xbb   : > { %v1202_v11 = vunpack.i.h.bf16 %v1200_v3  ;;  %v1201_v12 = vunpack.i.l.bf16 %v1200_v3 }
  0xbc   : > { %1072 = vmatmul.mubr.msk.bf16.vlgmr.msra.gmra.mrb[0].mxu0 %vm768_vm11, %v729_v0  ;;  %v672_v25 = vsel %vm665_vm4, %v663_v24, %v1206_v10  ;;  %v673_v26 = vsel %vm665_vm4, %v664_v23, %v1207_v9 }
  0xbd   : > { %v1215_v4 = vpop.permute.xlu1 %1214  ;;  %v671_v27 = vsel %vm665_vm4, %v662_v21, %v1202_v11  ;;  %v670_v28 = vsel %vm665_vm4, %v661_v22, %v1201_v12 }
  0xbe   : > { %v1210_v5 = vpop.permute.xlu0 %1209  ;;  %v1217_v15 = vunpack.i.h.bf16 %v1215_v4  ;;  %v1216_v16 = vunpack.i.l.bf16 %v1215_v4 }
  0xbf   : > { %v1212_v17 = vunpack.i.h.bf16 %v1210_v5  ;;  %v1211_v19 = vunpack.i.l.bf16 %v1210_v5 }
  0xc0   : > { %v681_v33 = vsel %vm674_vm5, %v672_v25, %v1216_v16  ;;  %v682_v18 = vsel %vm674_vm5, %v673_v26, %v1217_v15 }
  0xc1   : > { %v1225_v6 = vpop.permute.xlu1 %1224  ;;  %v679_v20 = vsel %vm674_vm5, %v670_v28, %v1211_v19  ;;  %v680_v34 = vsel %vm674_vm5, %v671_v27, %v1212_v17 }
  0xc2   : > { %v1220_v53 = vpop.permute.xlu0 %1219  ;;  %v1227_v2 = vunpack.i.h.bf16 %v1225_v6  ;;  %v1226_v31 = vunpack.i.l.bf16 %v1225_v6 }
  0xc3   : > { %v1222_v32 = vunpack.i.h.bf16 %v1220_v53  ;;  %v1221_v52 = vunpack.i.l.bf16 %v1220_v53 }
  0xc4   : > { %v690_v45 = vsel %vm683_vm6, %v681_v33, %v1226_v31  ;;  %v691_v46 = vsel %vm683_vm6, %v682_v18, %v1227_v2 }
  0xc5   : > { %v1235_v13 = vpop.permute.xlu1 %1234  ;;  %v688_v47 = vsel %vm683_vm6, %v679_v20, %v1221_v52  ;;  %v689_v48 = vsel %vm683_vm6, %v680_v34, %v1222_v32 }
  0xc6   : > { %v1230_v14 = vpop.permute.xlu0 %1229  ;;  %v1237_v35 = vunpack.i.h.bf16 %v1235_v13  ;;  %v1236_v36 = vunpack.i.l.bf16 %v1235_v13 }
  0xc7   : > { %v1232_v37 = vunpack.i.h.bf16 %v1230_v14  ;;  %v1231_v38 = vunpack.i.l.bf16 %v1230_v14 }
  0xc8   : > { %v699_v57 = vsel %vm692_vm7, %v690_v45, %v1236_v36  ;;  %v700_v58 = vsel %vm692_vm7, %v691_v46, %v1237_v35 }
  0xc9   : > { %v1245_v29 = vpop.permute.xlu1 %1244  ;;  %v697_v59 = vsel %vm692_vm7, %v688_v47, %v1231_v38  ;;  %v698_v60 = vsel %vm692_vm7, %v689_v48, %v1232_v37 }
  0xca   : > { %v1240_v30 = vpop.permute.xlu0 %1239  ;;  %v1247_v39 = vunpack.i.h.bf16 %v1245_v29  ;;  %v1246_v40 = vunpack.i.l.bf16 %v1245_v29 }
  0xcb   : > { %v1242_v41 = vunpack.i.h.bf16 %v1240_v30  ;;  %v1241_v42 = vunpack.i.l.bf16 %v1240_v30 }
  0xcc   : > { %v708_v61 = vsel %vm701_vm8, %v699_v57, %v1246_v40  ;;  %v709_v62 = vsel %vm701_vm8, %v700_v58, %v1247_v39 }
  0xcd   : > { %v1255_v43 = vpop.permute.xlu1 %1254  ;;  %v706_v63 = vsel %vm701_vm8, %v697_v59, %v1241_v42  ;;  %v707_v0 = vsel %vm701_vm8, %v698_v60, %v1242_v41 }
  0xce   : > { %v1250_v44 = vpop.permute.xlu0 %1249  ;;  %v1257_v49 = vunpack.i.h.bf16 %v1255_v43  ;;  %v1256_v50 = vunpack.i.l.bf16 %v1255_v43 }
  0xcf   : > { %v1252_v55 = vunpack.i.h.bf16 %v1250_v44  ;;  %v1251_v56 = vunpack.i.l.bf16 %v1250_v44 }
  0xd0   : > { %v717_v7 = vsel %vm710_vm9, %v708_v61, %v1256_v50  ;;  %v718_v51 = vsel %vm710_vm9, %v709_v62, %v1257_v49 }
  0xd1   : > { %v1265_v1 = vpop.permute.xlu1 %1264  ;;  %v715_v8 = vsel %vm710_vm9, %v706_v63, %v1251_v56  ;;  %v716_v54 = vsel %vm710_vm9, %v707_v0, %v1252_v55 }
  0xd2   : > { %v1260_v3 = vpop.permute.xlu0 %1259  ;;  %v1267_v4 = vunpack.i.h.bf16 %v1265_v1  ;;  %v1266_v5 = vunpack.i.l.bf16 %v1265_v1 }
  0xd3   : > { %v1262_v6 = vunpack.i.h.bf16 %v1260_v3  ;;  %v1261_v53 = vunpack.i.l.bf16 %v1260_v3 }
  0xd4   : > { %v726_v9 = vsel %vm719_vm10, %v717_v7, %v1266_v5  ;;  %v727_v10 = vsel %vm719_vm10, %v718_v51, %v1267_v4 }
  0xd5   : > { %v724_v11 = vsel %vm719_vm10, %v715_v8, %v1261_v53  ;;  %v725_v12 = vsel %vm719_vm10, %v716_v54, %v1262_v6  ;;  %v731_v13 = vpack.c.bf16 %v727_v10, %v726_v9 }
  0xd6   : > { %v730_v14 = vpack.c.bf16 %v725_v12, %v724_v11 }
  0xd8   : > { %1075 = vmatprep.mubr.msk.bf16.mxu1 %vm768_vm11, %v730_v14 }
  0xd9   : > { %1076 = vmatmul.mubr.msk.bf16.vlgmr.msra.gmra.mrb[0].mxu1 %vm768_vm11, %v731_v13 }
 0x18f   : > { %v1073_v15 = vpop.f32.mrb[0].mxu0 }
 0x190   : > { %v852_v16 = vpack.c.bf16 %v1073_v15, %v1073_v15  ;;  %v819_v17 = vpop.f32.mrb[1].mxu0  ;;  %v890_v23 = vmul.f32 %v1073_v15, %v1073_v15  ;;  %v870_v2 = vsel %vm291_vm0, %v1073_v15, 0.0 }
 0x191   : > { %v850_v19 = vpack.c.bf16 %v819_v17, %v819_v17  ;;  %v888_v21 = vmul.f32 %v819_v17, %v819_v17  ;;  %v1074_v22 = vpop.f32.mrb[2].mxu0  ;;  %v867_v26 = vsel %vm291_vm0, %v819_v17, 0.0 }
 0x192   : > { %861 = vst.msk [vmem:[%s1538_s26 + $0x8] sm:$0xf] %vm858_vm12, %v852_v16  ;;  %v853_v24 = vpack.c.bf16 %v1074_v22, %v1074_v22  ;;  %v822_v25 = vpop.f32.mrb[3].mxu0  ;;  %v891_v32 = vmul.f32 %v1074_v22, %v1074_v22  ;;  %v899_v20 = vsel %vm291_vm0, %v890_v23, 0.0  ;;  %v872_v34 = vsel %vm291_vm0, %v1074_v22, 0.0 }
 0x193   : > { %859 = vst.msk [vmem:[%s1538_s26] sm:$0xf] %vm858_vm12, %v850_v19  ;;  %v851_v27 = vpack.c.bf16 %v822_v25, %v822_v25  ;;  %v868_v28 = vsel %vm291_vm0, %v822_v25, 0.0  ;;  %v889_v29 = vmul.f32 %v822_v25, %v822_v25  ;;  %v896_v31 = vsel %vm291_vm0, %v888_v21, 0.0 }
 0x194   : > { %862 = vst.msk [vmem:[%s1538_s26 + $0xc] sm:$0xf] %vm858_vm12, %v853_v24  ;;  %v869_v30 = vadd.f32 %v868_v28, %v867_v26  ;;  %v901_v37 = vsel %vm291_vm0, %v891_v32, 0.0 }
 0x195   : > { %860 = vst.msk [vmem:[%s1538_s26 + $0x4] sm:$0xf] %vm858_vm12, %v851_v27  ;;  %v897_v52 = vsel %vm291_vm0, %v889_v29, 0.0 }
 0x196   : > { %v871_v33 = vadd.f32 %v870_v2, %v869_v30  ;;  %v898_v18 = vadd.f32 %v897_v52, %v896_v31 }
 0x198   : > { %v900_v35 = vadd.f32 %v899_v20, %v898_v18  ;;  %v873_v36 = vadd.f32 %v872_v34, %v871_v33 }
 0x19a   : > { %v902_v38 = vadd.f32 %v901_v37, %v900_v35 }
 0x1ac   : > { %v1077_v39 = vpop.f32.mrb[0].mxu1 }
 0x1ad   : > { %v856_v40 = vpack.c.bf16 %v1077_v39, %v1077_v39  ;;  %v835_v41 = vpop.f32.mrb[1].mxu1  ;;  %v894_v56 = vmul.f32 %v1077_v39, %v1077_v39  ;;  %v878_v60 = vsel %vm291_vm0, %v1077_v39, 0.0 }
 0x1ae   : > { %v854_v42 = vpack.c.bf16 %v835_v41, %v835_v41  ;;  %v874_v43 = vsel %vm291_vm0, %v835_v41, 0.0  ;;  %v892_v44 = vmul.f32 %v835_v41, %v835_v41  ;;  %v1078_v45 = vpop.f32.mrb[2].mxu1 }
 0x1af   : > { %865 = vst.msk [vmem:[%s1538_s26 + $0x18] sm:$0xf] %vm858_vm12, %v856_v40  ;;  %v875_v46 = vadd.f32 %v874_v43, %v873_v36  ;;  %v857_v47 = vpack.c.bf16 %v1078_v45, %v1078_v45  ;;  %v838_v48 = vpop.f32.mrb[3].mxu1  ;;  %v895_v61 = vmul.f32 %v1078_v45, %v1078_v45  ;;  %v880_v0 = vsel %vm291_vm0, %v1078_v45, 0.0 }
 0x1b0   : > { %863 = vst.msk [vmem:[%s1538_s26 + $0x10] sm:$0xf] %vm858_vm12, %v854_v42  ;;  %v903_v49 = vsel %vm291_vm0, %v892_v44, 0.0  ;;  %v855_v50 = vpack.c.bf16 %v838_v48, %v838_v48  ;;  %v876_v55 = vsel %vm291_vm0, %v838_v48, 0.0  ;;  %v893_v59 = vmul.f32 %v838_v48, %v838_v48 }
 0x1b1   : > { %v904_v57 = vadd.f32 %v903_v49, %v902_v38  ;;  %866 = vst.msk [vmem:[%s1538_s26 + $0x1c] sm:$0xf] %vm858_vm12, %v857_v47  ;;  %v877_v58 = vadd.f32 %v876_v55, %v875_v46  ;;  %v907_v3 = vsel %vm291_vm0, %v894_v56, 0.0  ;;  %v909_v6 = vsel %vm291_vm0, %v895_v61, 0.0 }
 0x1b2   : > { %864 = vst.msk [vmem:[%s1538_s26 + $0x14] sm:$0xf] %vm858_vm12, %v855_v50  ;;  %v905_v63 = vsel %vm291_vm0, %v893_v59, 0.0 }
 0x1b3   : > { %v879_v62 = vadd.f32 %v878_v60, %v877_v58  ;;  %v906_v1 = vadd.f32 %v905_v63, %v904_v57 }
 0x1b5   : > { %v881_v4 = vadd.f32 %v880_v0, %v879_v62  ;;  %v908_v5 = vadd.f32 %v907_v3, %v906_v1 }
 0x1b7   : > { %v882_v53 = vrot.slane %v881_v4, 4  ;;  %v910_v7 = vadd.f32 %v909_v6, %v908_v5 }
 0x1b9   : > { %v883_v51 = vadd.f32 %v882_v53, %v881_v4  ;;  %v911_v8 = vrot.slane %v910_v7, 4 }
 0x1bb   : > { %v884_v54 = vrot.slane %v883_v51, 2  ;;  %v912_v9 = vadd.f32 %v911_v8, %v910_v7 }
 0x1bd   : > { %v885_v10 = vadd.f32 %v884_v54, %v883_v51  ;;  %v913_v11 = vrot.slane %v912_v9, 2 }
 0x1bf   : > { %v886_v12 = vrot.slane %v885_v10, 1  ;;  %v914_v13 = vadd.f32 %v913_v11, %v912_v9 }
 0x1c1   : > { %v915_v14 = vrot.slane %v914_v13, 1  ;;  %v887_v15 = vadd.f32 %v886_v12, %v885_v10 }
 0x1c3   : > { %v916_v16 = vadd.f32 %v915_v14, %v914_v13 }
 0x1c5   : > { %v918_v17 = vsel %vm917_vm13, %v887_v15, %v916_v16 }
 0x1c6   : > { %v920_v19 = vsel %vm919_vm14, %v918_v17, 0.0 }
 0x1c7   : > { %921 = vst.msk [vmem:[%s235_s29] sm:$0xff] %vm291_vm0, %v920_v19 }
 0x1c8 PF: > { %s16_s18 = sadd.s32 1, %s1279_s18  }
 0x1c9   : > { %p13_p4 = scmp.ge.s32.totalorder %s16_s18, 4  }
 0x1cb   :  { %15 = sbr.rel (!%p13_p4) target bundleno = 1 (0x1), region = 81 }

</bundles_post_ra>
